<compile_context>
chip_gen: v5e
topology: v5e:2x2
jax: 0.10.0
libtpu: 0.0.40
codegen_flags: <defaults>
</compile_context>

<pallas_src>
import functools

import jax
import jax.numpy as jnp
from jax import lax
from jax.experimental import pallas as pl
from jax.experimental.pallas import tpu as pltpu

EPS = 1e-6     # TODO(synk): only used by EMALoss.backward in the reference; kept for parity.
HIDDEN = 400   # logical hidden width of T
LANE = 128
SUBLANE = 8


def _round_up(v, m):
    return (v + m - 1) // m * m


# -----------------------------------------------------------------------------
# Kernel
# -----------------------------------------------------------------------------
def _mine_tile_kernel(n_valid, tile_n,
                      x_ref, z_ref, zm_ref,
                      w1x_ref, w1z_ref, b1_ref,
                      w2_ref, b2_ref, w3_ref, b3_ref,
                      w4t_ref, b4_ref,
                      sum_t_ref, sum_e_ref):
    """One batch tile: fused joint+marginal MLP pass + masked partial sums."""
    i = pl.program_id(0)
    f32 = jnp.float32

    # ---- layer 1: x @ W1_x is shared by the joint and marginal branches ----
    xw = jnp.dot(x_ref[...], w1x_ref[...], preferred_element_type=f32)
    zw_j = jnp.dot(z_ref[...], w1z_ref[...], preferred_element_type=f32)
    zw_m = jnp.dot(zm_ref[...], w1z_ref[...], preferred_element_type=f32)
    b1 = b1_ref[...]
    # Stack joint rows on top of marginal rows -> layers 2..4 run once on (2T, H).
    h = jnp.concatenate([xw + zw_j + b1, xw + zw_m + b1], axis=0)
    h = jnp.maximum(h, 0.0)

    # ---- layers 2-3: bf16 MXU matmuls, f32 accumulation ----
    h = jnp.dot(h.astype(jnp.bfloat16), w2_ref[...],
                preferred_element_type=f32) + b2_ref[...]
    h = jnp.maximum(h, 0.0)
    h = jnp.dot(h.astype(jnp.bfloat16), w3_ref[...],
                preferred_element_type=f32) + b3_ref[...]
    h = jnp.maximum(h, 0.0)

    # ---- layer 4: width-1 output as VPU multiply + row reduction ----
    t = jnp.sum(h * w4t_ref[...], axis=-1, keepdims=True) + b4_ref[...]   # (2T, 1)
    t_joint = t[:tile_n]
    t_marg = t[tile_n:]

    # ---- masked partial sums for this tile (batch was zero-row padded) ----
    row = i * tile_n + lax.broadcasted_iota(jnp.int32, (tile_n, 1), 0)
    valid = row < n_valid
    sum_t = jnp.sum(jnp.where(valid, t_joint, 0.0))
    sum_e = jnp.sum(jnp.where(valid, jnp.exp(t_marg), 0.0))
    sum_t_ref[...] = jnp.reshape(sum_t, (1, 1, 1))
    sum_e_ref[...] = jnp.reshape(sum_e, (1, 1, 1))


# -----------------------------------------------------------------------------
# Parameter preparation (done once): split W1, pad hidden 400 -> 512, cast bf16.
# -----------------------------------------------------------------------------
def prepare_t_params(params, x_dim):
    w1, b1, w2, b2, w3, b3, w4, b4 = params
    h = w1.shape[1]
    hp = _round_up(h, LANE)                       # 400 -> 512

    def pad_cols(a):
        return jnp.pad(a, ((0, 0), (0, hp - h)))

    w1p = pad_cols(w1)                            # (D_in, Hp)
    w1x = w1p[:x_dim].astype(jnp.bfloat16)
    w1z = w1p[x_dim:].astype(jnp.bfloat16)
    b1p = pad_cols(b1).astype(jnp.float32)        # (1, Hp)
    w2p = jnp.pad(w2, ((0, hp - h), (0, hp - h))).astype(jnp.bfloat16)
    b2p = pad_cols(b2).astype(jnp.float32)
    w3p = jnp.pad(w3, ((0, hp - h), (0, hp - h))).astype(jnp.bfloat16)
    b3p = pad_cols(b3).astype(jnp.float32)
    w4t = jnp.pad(w4, ((0, hp - h), (0, 0))).T.astype(jnp.float32)   # (1, Hp)
    b4r = jnp.reshape(b4, (1, 1)).astype(jnp.float32)
    return (w1x, w1z, b1p, w2p, b2p, w3p, b3p, w4t, b4r)


# -----------------------------------------------------------------------------
# Wrapper
# -----------------------------------------------------------------------------
def mine_forward_pallas(x, z, z_marg, prepared, tile_n=None):
    """Returns (loss_scalar, mean_exp_t_marg_scalar)."""
    n, d_x = x.shape
    d_z = z.shape[1]
    if tile_n is None:
        # Big enough to pipeline DMAs / fill the MXU, small enough for v7x's
        # 64 MiB physical / 32 MiB scoped VMEM (activations ~ (2*T, 512) f32).
        tile_n = min(256, _round_up(n, SUBLANE))
    tile_n = _round_up(tile_n, SUBLANE)
    g = pl.cdiv(n, tile_n)
    n_pad = g * tile_n

    def pad_rows(a):
        return jnp.pad(a, ((0, n_pad - n), (0, 0))).astype(jnp.bfloat16)

    xb, zb, zmb = pad_rows(x), pad_rows(z), pad_rows(z_marg)
    w1x, w1z, b1, w2, b2, w3, b3, w4t, b4 = prepared

    kernel = functools.partial(_mine_tile_kernel, n, tile_n)

    data_specs = [
        pl.BlockSpec((tile_n, d_x), lambda i: (i, 0)),
        pl.BlockSpec((tile_n, d_z), lambda i: (i, 0)),
        pl.BlockSpec((tile_n, d_z), lambda i: (i, 0)),
    ]
    # Weights/biases stay resident in VMEM across all batch tiles.
    weight_specs = [
        pl.BlockSpec(w1x.shape, lambda i: (0, 0)),
        pl.BlockSpec(w1z.shape, lambda i: (0, 0)),
        pl.BlockSpec(b1.shape, lambda i: (0, 0)),
        pl.BlockSpec(w2.shape, lambda i: (0, 0)),
        pl.BlockSpec(b2.shape, lambda i: (0, 0)),
        pl.BlockSpec(w3.shape, lambda i: (0, 0)),
        pl.BlockSpec(b3.shape, lambda i: (0, 0)),
        pl.BlockSpec(w4t.shape, lambda i: (0, 0)),
        pl.BlockSpec(b4.shape, lambda i: (0, 0)),
    ]
    out_shape = (jax.ShapeDtypeStruct((g, 1, 1), jnp.float32),
                 jax.ShapeDtypeStruct((g, 1, 1), jnp.float32))
    out_specs = (pl.BlockSpec((1, 1, 1), lambda i: (i, 0, 0)),
                 pl.BlockSpec((1, 1, 1), lambda i: (i, 0, 0)))

    sum_t, sum_e = pl.pallas_call(
        kernel,
        out_shape=out_shape,
        grid=(g,),
        in_specs=data_specs + weight_specs,
        out_specs=out_specs,
        compiler_params=pltpu.CompilerParams(
            # Per-tile partial sums -> no cross-step carry -> the batch axis can
            # be 'parallel' and shard across both v7x TensorCores.
            dimension_semantics=("parallel",),
            vmem_limit_bytes=32 * 1024 * 1024),
    )(xb, zb, zmb, w1x, w1z, b1, w2, b2, w3, b3, w4t, b4)

    # Tiny finalize in the wrapper (keeps the kernel grid axis parallel).
    t_mean = jnp.sum(sum_t) / n
    t_exp_mean = jnp.sum(sum_e) / n
    loss = -t_mean + jnp.log(t_exp_mean)
    return loss, t_exp_mean


def init_t_params(key, x_dim, z_dim, hidden=HIDDEN):
    """Deterministic init matching nn.Linear default U(-1/sqrt(fan_in), ...)."""
    d_in = x_dim + z_dim
    dims = [(d_in, hidden), (hidden, hidden), (hidden, hidden), (hidden, 1)]
    params = []
    keys = jax.random.split(key, 2 * len(dims))
    for idx, (fi, fo) in enumerate(dims):
        k = 1.0 / jnp.sqrt(jnp.float32(fi))
        w = jax.random.uniform(keys[2 * idx], (fi, fo), jnp.float32, -k, k)
        b = jax.random.uniform(keys[2 * idx + 1], (1, fo), jnp.float32, -k, k)
        params.extend([w, b])
    return tuple(params)


class MinePallas:
    """Thin stateful wrapper reproducing Mine(loss='mine') forward semantics."""

    def __init__(self, params, x_dim, alpha=0.01):
        self.prepared = prepare_t_params(params, x_dim)
        self.alpha = alpha
        self.running_mean = jnp.float32(0.0)   # device scalar: no host sync per step

        prepared = self.prepared
        a = alpha

        def step(x, z, z_marg, running_mean):
            loss, t_exp = mine_forward_pallas(x, z, z_marg, prepared)
            new_rm = jnp.where(running_mean == 0, t_exp,
                               a * t_exp + (1.0 - a) * running_mean)
            return loss, new_rm

        self._step = jax.jit(step)

    def forward(self, x, z, z_marg=None, *, perm_key=None):
        if z_marg is None:
            if perm_key is None:
                perm_key = jax.random.PRNGKey(1)
            perm = jax.random.permutation(perm_key, x.shape[0])
            z_marg = z[perm]
        loss, self.running_mean = self._step(x, z, z_marg, self.running_mean)
        return loss


if __name__ == "__main__":
    key = jax.random.PRNGKey(0)
    k_params, k_x, k_z, k_perm = jax.random.split(key, 4)

    batch, x_dim, z_dim = 8, 4, 4
    x = jax.random.normal(k_x, (batch, x_dim), jnp.float32)
    z = jax.random.normal(k_z, (batch, z_dim), jnp.float32)

    params = init_t_params(k_params, x_dim, z_dim)
    mine = MinePallas(params, x_dim, alpha=0.01)

    loss = mine.forward(x, z, perm_key=k_perm)
    loss = jax.block_until_ready(loss)

    # Pure-JAX f32 reference of the same forward math.
    def ref_mlp(xz, p):
        w1, b1, w2, b2, w3, b3, w4, b4 = p
        h = jnp.maximum(xz @ w1 + b1, 0.0)
        h = jnp.maximum(h @ w2 + b2, 0.0)
        h = jnp.maximum(h @ w3 + b3, 0.0)
        return h @ w4 + b4

    perm = jax.random.permutation(k_perm, batch)
    z_marg = z[perm]
    t_ref = jnp.mean(ref_mlp(jnp.concatenate([x, z], 1), params))
    second_ref = jnp.log(jnp.mean(jnp.exp(ref_mlp(jnp.concatenate([x, z_marg], 1), params))))
    loss_ref = -t_ref + second_ref

    # Kernel uses bf16 matmul inputs with f32 accumulation -> small numeric delta
    # vs the pure-f32 reference is expected.
    assert jnp.allclose(loss, loss_ref, atol=2e-2, rtol=2e-2), (float(loss), float(loss_ref))
    print("KERNEL_OK")
</pallas_src>

<mosaic_0001>
module attributes {stable_mosaic.version = 11 : i64} {
  func.func @_mine_tile_kernel(%arg0: i32, %arg1: memref<8x4xbf16, #tpu.memory_space<vmem>>, %arg2: memref<8x4xbf16, #tpu.memory_space<vmem>>, %arg3: memref<8x4xbf16, #tpu.memory_space<vmem>>, %arg4: memref<4x512xbf16, #tpu.memory_space<vmem>>, %arg5: memref<4x512xbf16, #tpu.memory_space<vmem>>, %arg6: memref<1x512xf32, #tpu.memory_space<vmem>>, %arg7: memref<512x512xbf16, #tpu.memory_space<vmem>>, %arg8: memref<1x512xf32, #tpu.memory_space<vmem>>, %arg9: memref<512x512xbf16, #tpu.memory_space<vmem>>, %arg10: memref<1x512xf32, #tpu.memory_space<vmem>>, %arg11: memref<1x512xf32, #tpu.memory_space<vmem>>, %arg12: memref<1x1xf32, #tpu.memory_space<vmem>>, %arg13: memref<1x1x1xf32, #tpu.memory_space<vmem>>, %arg14: memref<1x1x1xf32, #tpu.memory_space<vmem>>) attributes {dimension_semantics = [#tpu.dimension_semantics<parallel>], iteration_bounds = array<i64: 1>, scalar_prefetch = 0 : i64, scratch_operands = 0 : i64, tpu.core_type = #tpu.core_type<tc>, window_params = [{transform_indices = @transform_0, window_bounds = array<i64: 8, 4>}, {transform_indices = @transform_1, window_bounds = array<i64: 8, 4>}, {transform_indices = @transform_2, window_bounds = array<i64: 8, 4>}, {pipeline_mode = #tpu.pipeline_mode<synchronous>, transform_indices = @transform_3, window_bounds = array<i64: 4, 512>}, {pipeline_mode = #tpu.pipeline_mode<synchronous>, transform_indices = @transform_4, window_bounds = array<i64: 4, 512>}, {pipeline_mode = #tpu.pipeline_mode<synchronous>, transform_indices = @transform_5, window_bounds = array<i64: 1, 512>}, {pipeline_mode = #tpu.pipeline_mode<synchronous>, transform_indices = @transform_6, window_bounds = array<i64: 512, 512>}, {pipeline_mode = #tpu.pipeline_mode<synchronous>, transform_indices = @transform_7, window_bounds = array<i64: 1, 512>}, {pipeline_mode = #tpu.pipeline_mode<synchronous>, transform_indices = @transform_8, window_bounds = array<i64: 512, 512>}, {pipeline_mode = #tpu.pipeline_mode<synchronous>, transform_indices = @transform_9, window_bounds = array<i64: 1, 512>}, {pipeline_mode = #tpu.pipeline_mode<synchronous>, transform_indices = @transform_10, window_bounds = array<i64: 1, 512>}, {pipeline_mode = #tpu.pipeline_mode<synchronous>, transform_indices = @transform_11, window_bounds = array<i64: 1, 1>}, {transform_indices = @transform_12, window_bounds = array<i64: 1, 1, 1>}, {transform_indices = @transform_13, window_bounds = array<i64: 1, 1, 1>}]} {
    %c0 = arith.constant 0 : index
    %c0_0 = arith.constant 0 : index
    %0 = vector.load %arg1[%c0, %c0_0] : memref<8x4xbf16, #tpu.memory_space<vmem>>, vector<8x4xbf16>
    %c0_1 = arith.constant 0 : index
    %c0_2 = arith.constant 0 : index
    %1 = vector.load %arg4[%c0_1, %c0_2] : memref<4x512xbf16, #tpu.memory_space<vmem>>, vector<4x512xbf16>
    %cst = arith.constant dense<0.000000e+00> : vector<8x512xf32>
    %2 = tpu.matmul %0, %1, %cst {dimension_numbers = #tpu.dot_dimension_numbers<[1], [0], [0], [1], [0, 0, 1, 1], [], []>} : vector<8x4xbf16>, vector<4x512xbf16>, vector<8x512xf32> -> vector<8x512xf32>
    %c0_3 = arith.constant 0 : index
    %c0_4 = arith.constant 0 : index
    %3 = vector.load %arg2[%c0_3, %c0_4] : memref<8x4xbf16, #tpu.memory_space<vmem>>, vector<8x4xbf16>
    %c0_5 = arith.constant 0 : index
    %c0_6 = arith.constant 0 : index
    %4 = vector.load %arg5[%c0_5, %c0_6] : memref<4x512xbf16, #tpu.memory_space<vmem>>, vector<4x512xbf16>
    %cst_7 = arith.constant dense<0.000000e+00> : vector<8x512xf32>
    %5 = tpu.matmul %3, %4, %cst_7 {dimension_numbers = #tpu.dot_dimension_numbers<[1], [0], [0], [1], [0, 0, 1, 1], [], []>} : vector<8x4xbf16>, vector<4x512xbf16>, vector<8x512xf32> -> vector<8x512xf32>
    %c0_8 = arith.constant 0 : index
    %c0_9 = arith.constant 0 : index
    %6 = vector.load %arg3[%c0_8, %c0_9] : memref<8x4xbf16, #tpu.memory_space<vmem>>, vector<8x4xbf16>
    %c0_10 = arith.constant 0 : index
    %c0_11 = arith.constant 0 : index
    %7 = vector.load %arg5[%c0_10, %c0_11] : memref<4x512xbf16, #tpu.memory_space<vmem>>, vector<4x512xbf16>
    %cst_12 = arith.constant dense<0.000000e+00> : vector<8x512xf32>
    %8 = tpu.matmul %6, %7, %cst_12 {dimension_numbers = #tpu.dot_dimension_numbers<[1], [0], [0], [1], [0, 0, 1, 1], [], []>} : vector<8x4xbf16>, vector<4x512xbf16>, vector<8x512xf32> -> vector<8x512xf32>
    %c0_13 = arith.constant 0 : index
    %c0_14 = arith.constant 0 : index
    %9 = vector.load %arg6[%c0_13, %c0_14] : memref<1x512xf32, #tpu.memory_space<vmem>>, vector<1x512xf32>
    %10 = arith.addf %2, %5 : vector<8x512xf32>
    %11 = vector.broadcast %9 : vector<1x512xf32> to vector<8x512xf32>
    %12 = arith.addf %10, %11 : vector<8x512xf32>
    %13 = arith.addf %2, %8 : vector<8x512xf32>
    %14 = vector.broadcast %9 : vector<1x512xf32> to vector<8x512xf32>
    %15 = arith.addf %13, %14 : vector<8x512xf32>
    %16 = tpu.concatenate %12, %15 in 0 : vector<8x512xf32>, vector<8x512xf32> -> vector<16x512xf32>
    %cst_15 = arith.constant 0.000000e+00 : f32
    %17 = vector.broadcast %cst_15 : f32 to vector<16x512xf32>
    %18 = arith.maximumf %16, %17 : vector<16x512xf32>
    %19 = arith.truncf %18 : vector<16x512xf32> to vector<16x512xbf16>
    %c0_16 = arith.constant 0 : index
    %c0_17 = arith.constant 0 : index
    %20 = vector.load %arg7[%c0_16, %c0_17] : memref<512x512xbf16, #tpu.memory_space<vmem>>, vector<512x512xbf16>
    %cst_18 = arith.constant dense<0.000000e+00> : vector<16x512xf32>
    %21 = tpu.matmul %19, %20, %cst_18 {dimension_numbers = #tpu.dot_dimension_numbers<[1], [0], [0], [1], [0, 0, 1, 1], [], []>} : vector<16x512xbf16>, vector<512x512xbf16>, vector<16x512xf32> -> vector<16x512xf32>
    %c0_19 = arith.constant 0 : index
    %c0_20 = arith.constant 0 : index
    %22 = vector.load %arg8[%c0_19, %c0_20] : memref<1x512xf32, #tpu.memory_space<vmem>>, vector<1x512xf32>
    %23 = vector.broadcast %22 : vector<1x512xf32> to vector<16x512xf32>
    %24 = arith.addf %21, %23 : vector<16x512xf32>
    %cst_21 = arith.constant 0.000000e+00 : f32
    %25 = vector.broadcast %cst_21 : f32 to vector<16x512xf32>
    %26 = arith.maximumf %24, %25 : vector<16x512xf32>
    %27 = arith.truncf %26 : vector<16x512xf32> to vector<16x512xbf16>
    %c0_22 = arith.constant 0 : index
    %c0_23 = arith.constant 0 : index
    %28 = vector.load %arg9[%c0_22, %c0_23] : memref<512x512xbf16, #tpu.memory_space<vmem>>, vector<512x512xbf16>
    %cst_24 = arith.constant dense<0.000000e+00> : vector<16x512xf32>
    %29 = tpu.matmul %27, %28, %cst_24 {dimension_numbers = #tpu.dot_dimension_numbers<[1], [0], [0], [1], [0, 0, 1, 1], [], []>} : vector<16x512xbf16>, vector<512x512xbf16>, vector<16x512xf32> -> vector<16x512xf32>
    %c0_25 = arith.constant 0 : index
    %c0_26 = arith.constant 0 : index
    %30 = vector.load %arg10[%c0_25, %c0_26] : memref<1x512xf32, #tpu.memory_space<vmem>>, vector<1x512xf32>
    %31 = vector.broadcast %30 : vector<1x512xf32> to vector<16x512xf32>
    %32 = arith.addf %29, %31 : vector<16x512xf32>
    %cst_27 = arith.constant 0.000000e+00 : f32
    %33 = vector.broadcast %cst_27 : f32 to vector<16x512xf32>
    %34 = arith.maximumf %32, %33 : vector<16x512xf32>
    %c0_28 = arith.constant 0 : index
    %c0_29 = arith.constant 0 : index
    %35 = vector.load %arg11[%c0_28, %c0_29] : memref<1x512xf32, #tpu.memory_space<vmem>>, vector<1x512xf32>
    %36 = vector.broadcast %35 : vector<1x512xf32> to vector<16x512xf32>
    %37 = arith.mulf %34, %36 : vector<16x512xf32>
    %cst_30 = arith.constant dense<0.000000e+00> : vector<16xf32>
    %38 = vector.multi_reduction <add>, %37, %cst_30 [1] : vector<16x512xf32> to vector<16xf32>
    %39 = vector.shape_cast %38 : vector<16xf32> to vector<16x1xf32>
    %c0_31 = arith.constant 0 : index
    %c0_32 = arith.constant 0 : index
    %40 = vector.load %arg12[%c0_31, %c0_32] : memref<1x1xf32, #tpu.memory_space<vmem>>, vector<1x1xf32>
    %41 = vector.broadcast %40 : vector<1x1xf32> to vector<16x1xf32>
    %42 = arith.addf %39, %41 : vector<16x1xf32>
    %43 = vector.extract_strided_slice %42 {offsets = [0, 0], sizes = [8, 1], strides = [1, 1]} : vector<16x1xf32> to vector<8x1xf32>
    %44 = vector.extract_strided_slice %42 {offsets = [8, 0], sizes = [8, 1], strides = [1, 1]} : vector<16x1xf32> to vector<8x1xf32>
    %c8_i32 = arith.constant 8 : i32
    %45 = arith.muli %arg0, %c8_i32 : i32
    %46 = tpu.iota {dimensions = array<i32: 0>} : vector<8x1xi32>
    %47 = vector.broadcast %45 : i32 to vector<8x1xi32>
    %48 = arith.addi %47, %46 : vector<8x1xi32>
    %c8_i32_33 = arith.constant 8 : i32
    %49 = vector.broadcast %c8_i32_33 : i32 to vector<8x1xi32>
    %50 = arith.cmpi slt, %48, %49 : vector<8x1xi32>
    %cst_34 = arith.constant 0.000000e+00 : f32
    %51 = vector.broadcast %cst_34 : f32 to vector<8x1xf32>
    %52 = arith.select %50, %43, %51 : vector<8x1xi1>, vector<8x1xf32>
    %53 = vector.shape_cast %52 : vector<8x1xf32> to vector<1x8x1xf32>
    %cst_35 = arith.constant dense<0.000000e+00> : vector<1xf32>
    %54 = vector.multi_reduction <add>, %53, %cst_35 [1, 2] : vector<1x8x1xf32> to vector<1xf32>
    %55 = vector.shape_cast %54 : vector<1xf32> to vector<1x1x1xf32>
    %56 = vector.extract %55[0, 0, 0] : f32 from vector<1x1x1xf32>
    %57 = math.exp %44 : vector<8x1xf32>
    %cst_36 = arith.constant 0.000000e+00 : f32
    %58 = vector.broadcast %cst_36 : f32 to vector<8x1xf32>
    %59 = arith.select %50, %57, %58 : vector<8x1xi1>, vector<8x1xf32>
    %60 = vector.shape_cast %59 : vector<8x1xf32> to vector<1x8x1xf32>
    %cst_37 = arith.constant dense<0.000000e+00> : vector<1xf32>
    %61 = vector.multi_reduction <add>, %60, %cst_37 [1, 2] : vector<1x8x1xf32> to vector<1xf32>
    %62 = vector.shape_cast %61 : vector<1xf32> to vector<1x1x1xf32>
    %63 = vector.extract %62[0, 0, 0] : f32 from vector<1x1x1xf32>
    %64 = vector.broadcast %56 : f32 to vector<1x1x1xf32>
    %c0_38 = arith.constant 0 : index
    %c0_39 = arith.constant 0 : index
    %c0_40 = arith.constant 0 : index
    %65 = vector.load %arg13[%c0_38, %c0_39, %c0_40] : memref<1x1x1xf32, #tpu.memory_space<vmem>>, vector<1x1x1xf32>
    tpu.vector_store %arg13[%c0_38, %c0_39, %c0_40], %64 {strides = array<i32>} : memref<1x1x1xf32, #tpu.memory_space<vmem>>, vector<1x1x1xf32>,
    %66 = vector.broadcast %63 : f32 to vector<1x1x1xf32>
    %c0_41 = arith.constant 0 : index
    %c0_42 = arith.constant 0 : index
    %c0_43 = arith.constant 0 : index
    %67 = vector.load %arg14[%c0_41, %c0_42, %c0_43] : memref<1x1x1xf32, #tpu.memory_space<vmem>>, vector<1x1x1xf32>
    tpu.vector_store %arg14[%c0_41, %c0_42, %c0_43], %66 {strides = array<i32>} : memref<1x1x1xf32, #tpu.memory_space<vmem>>, vector<1x1x1xf32>,
    return
  }
  func.func @transform_0(%arg0: i32) -> (i32, i32) {
    %c0_i32 = arith.constant 0 : i32
    %c0_i32_0 = arith.constant 0 : i32
    return %arg0, %c0_i32 : i32, i32
  }
  func.func @transform_1(%arg0: i32) -> (i32, i32) {
    %c0_i32 = arith.constant 0 : i32
    %c0_i32_0 = arith.constant 0 : i32
    return %arg0, %c0_i32 : i32, i32
  }
  func.func @transform_2(%arg0: i32) -> (i32, i32) {
    %c0_i32 = arith.constant 0 : i32
    %c0_i32_0 = arith.constant 0 : i32
    return %arg0, %c0_i32 : i32, i32
  }
  func.func @transform_3(%arg0: i32) -> (i32, i32) {
    %c0_i32 = arith.constant 0 : i32
    %c0_i32_0 = arith.constant 0 : i32
    %c0_i32_1 = arith.constant 0 : i32
    return %c0_i32, %c0_i32_0 : i32, i32
  }
  func.func @transform_4(%arg0: i32) -> (i32, i32) {
    %c0_i32 = arith.constant 0 : i32
    %c0_i32_0 = arith.constant 0 : i32
    %c0_i32_1 = arith.constant 0 : i32
    return %c0_i32, %c0_i32_0 : i32, i32
  }
  func.func @transform_5(%arg0: i32) -> (i32, i32) {
    %c0_i32 = arith.constant 0 : i32
    %c0_i32_0 = arith.constant 0 : i32
    %c0_i32_1 = arith.constant 0 : i32
    return %c0_i32, %c0_i32_0 : i32, i32
  }
  func.func @transform_6(%arg0: i32) -> (i32, i32) {
    %c0_i32 = arith.constant 0 : i32
    %c0_i32_0 = arith.constant 0 : i32
    %c0_i32_1 = arith.constant 0 : i32
    return %c0_i32, %c0_i32_0 : i32, i32
  }
  func.func @transform_7(%arg0: i32) -> (i32, i32) {
    %c0_i32 = arith.constant 0 : i32
    %c0_i32_0 = arith.constant 0 : i32
    %c0_i32_1 = arith.constant 0 : i32
    return %c0_i32, %c0_i32_0 : i32, i32
  }
  func.func @transform_8(%arg0: i32) -> (i32, i32) {
    %c0_i32 = arith.constant 0 : i32
    %c0_i32_0 = arith.constant 0 : i32
    %c0_i32_1 = arith.constant 0 : i32
    return %c0_i32, %c0_i32_0 : i32, i32
  }
  func.func @transform_9(%arg0: i32) -> (i32, i32) {
    %c0_i32 = arith.constant 0 : i32
    %c0_i32_0 = arith.constant 0 : i32
    %c0_i32_1 = arith.constant 0 : i32
    return %c0_i32, %c0_i32_0 : i32, i32
  }
  func.func @transform_10(%arg0: i32) -> (i32, i32) {
    %c0_i32 = arith.constant 0 : i32
    %c0_i32_0 = arith.constant 0 : i32
    %c0_i32_1 = arith.constant 0 : i32
    return %c0_i32, %c0_i32_0 : i32, i32
  }
  func.func @transform_11(%arg0: i32) -> (i32, i32) {
    %c0_i32 = arith.constant 0 : i32
    %c0_i32_0 = arith.constant 0 : i32
    %c0_i32_1 = arith.constant 0 : i32
    return %c0_i32, %c0_i32_0 : i32, i32
  }
  func.func @transform_12(%arg0: i32) -> (i32, i32, i32) {
    %c0_i32 = arith.constant 0 : i32
    %c0_i32_0 = arith.constant 0 : i32
    %c0_i32_1 = arith.constant 0 : i32
    return %arg0, %c0_i32, %c0_i32_0 : i32, i32, i32
  }
  func.func @transform_13(%arg0: i32) -> (i32, i32, i32) {
    %c0_i32 = arith.constant 0 : i32
    %c0_i32_0 = arith.constant 0 : i32
    %c0_i32_1 = arith.constant 0 : i32
    return %arg0, %c0_i32, %c0_i32_0 : i32, i32, i32
  }
}

</mosaic_0001>

<bundles_post_ra>
// kernel: step.1
= control target key start
LH: loop header
LB: loop body
LE: loop exit
PB: predicated region body
PF: predicated region fallthrough
CT: control target
= control target key end

     0   :  { %s4083_s0 = inlined_call_operand.vmem [shape: bf16[8,4], index: 0, kind: input, shape index: {}]   ;;  %s4084_s1 = inlined_call_operand.vmem [shape: bf16[8,4], index: 1, kind: input, shape index: {}]   ;;  %s4085_s2 = inlined_call_operand.vmem [shape: bf16[8,4], index: 2, kind: input, shape index: {}]   ;;  %s4086_s3 = inlined_call_operand.vmem [shape: bf16[4,512], index: 3, kind: input, shape index: {}]   ;;  %s4087_s4 = inlined_call_operand.vmem [shape: bf16[4,512], index: 4, kind: input, shape index: {}]   ;;  %s4088_s5 = inlined_call_operand.vmem [shape: f32[1,512], index: 5, kind: input, shape index: {}]   ;;  %s4089_s6 = inlined_call_operand.hbm [shape: bf16[512,512], index: 6, kind: input, shape index: {}]   ;;  %s4090_s7 = inlined_call_operand.vmem [shape: f32[1,512], index: 7, kind: input, shape index: {}]   ;;  %s4091_s8 = inlined_call_operand.hbm [shape: bf16[512,512], index: 8, kind: input, shape index: {}]   ;;  %s4092_s9 = inlined_call_operand.vmem [shape: f32[1,512], index: 9, kind: input, shape index: {}]   ;;  %s4093_s10 = inlined_call_operand.vmem [shape: f32[1,512], index: 10, kind: input, shape index: {}]   ;;  %s4094_s11 = inlined_call_operand.<no memory space> [shape: f32[1,1], index: 11, kind: input, shape index: {}]   ;;  %s4095_s12 = inlined_call_operand.hbm [shape: f32[1,1,1], index: 12, kind: output, shape index: {0}]   ;;  %s4096_s13 = inlined_call_operand.hbm [shape: f32[1,1,1], index: 13, kind: output, shape index: {1}]  }
   0x1   :  { %v19_v0 = vstv %s4094_s11 }
   0x2   :  { %20 = vst [vmem:[#allocation2] sm:$0x1] %v19_v0 }
   0x3   :  { %21 = vsyncpa [#allocation4], 0 }
   0x4   :  { %22 = vsyncpa [#allocation7], 0 }
   0x5   :  { %23 = vsyncpa [#allocation5], 0 }
   0x6   :  { %24 = vsyncpa [#allocation10], 0  ;;  %s41_s29 = sshll.u32 %s4089_s6, 4  ;;  %s3868_s30 = smov [#allocation3]   ;;  %s42_s29 = int_to_ptr.hbm [resolvable:$true] %s41_s29 }
   0x7   :  { %s43_s14 = sshll.u32 %s3868_s30, 4  ;;  %s56_s17 = sshll.u32 %s4091_s8, 4  ;;  %s44_s14 = int_to_ptr.vmem [resolvable:$true] %s43_s14  ;;  %s57_s17 = int_to_ptr.hbm [resolvable:$true] %s56_s17 }
   0x8   :  { %s3869_s18 = smov 256   ;;  %s3870_s19 = smov 16  }
   0x9   :  { %49 = dma.hbm_to_vmem [thread:$0]  %s42_s29, 16384, %s44_s14, [#allocation4], %s3869_s18, %s3869_s18, %s3870_s19  }
   0xa   :  { %s3871_s11 = smov [#allocation6]  }
   0xb   :  { %s58_s20 = sshll.u32 %s3871_s11, 4  ;;  %s59_s20 = int_to_ptr.vmem [resolvable:$true] %s58_s20 }
   0xc   :  { %64 = dma.hbm_to_vmem [thread:$0]  %s57_s17, 16384, %s59_s20, [#allocation7], %s3869_s18, %s3869_s18, %s3870_s19  }
   0xd   :  { %3860 = dma.done.wait [#allocation4], 16384  }
   0xe   :  { %3861 = vsyncadd [#allocation4], 4294950912 }
   0xf   :  { %3862 = dma.done.wait [#allocation7], 16384  }
  0x10   :  { %3863 = vsyncadd [#allocation7], 4294950912  ;;  %v81_v1 = vld [vmem:[%s4086_s3] sm:$0xff]  ;;  %vm92_vm0 = vcmask 1041408   ;;  %vm88_vm1 = vcmask 31744   ;;  %vm2396_vm2 = vcmask 7168  }
  0x11   :  { %83 = vst [vmem:[#allocation1] ss:$4 sm:$0xff] %v81_v1  ;;  %v154_v2 = vld [vmem:[%s4087_s4] sm:$0xff]  ;;  %v2585_v21 = vld [vmem:[#allocation3 + $0xe0] sm:$0xf]  ;;  %s2432_s15 = sshll.u32 %s4095_s12, 4  ;;  %s2433_s15 = int_to_ptr.hbm [resolvable:$true] %s2432_s15 }
  0x12   :  { %v80_v10 = vld [vmem:[%s4083_s0] sm:$0xf]  ;;  %v3525_v22 = vld [vmem:[#allocation3 + $0xec] sm:$0xf0]  ;;  %v2713_v23 = vld [vmem:[#allocation3 + $0x1e0] sm:$0xf] }
  0x13   :  { %v153_v20 = vld [vmem:[%s4084_s1] sm:$0xf]  ;;  %v3557_v24 = vld [vmem:[#allocation3 + $0x1ec] sm:$0xf0]  ;;  %v2841_v25 = vld [vmem:[#allocation3 + $0x2e0] sm:$0xf]  ;;  %v2586_v38 = vor.u32 %v3525_v22, %v2585_v21 }
  0x14   :  { %v3589_v26 = vld [vmem:[#allocation3 + $0x2ec] sm:$0xf0]  ;;  %v2969_v27 = vld [vmem:[#allocation3 + $0x3e0] sm:$0xf]  ;;  %v2714_v39 = vor.u32 %v3557_v24, %v2713_v23  ;;  %vm2421_vm3 = vcmask 0   ;;  %s3873_s17 = smov [#allocation9]  }
  0x15   :  { %v3621_v28 = vld [vmem:[#allocation3 + $0x3ec] sm:$0xf0]  ;;  %v2569_v31 = vld [vmem:[#allocation3 + $0xc0] sm:$0xf]  ;;  %v2842_v43 = vor.u32 %v3589_v26, %v2841_v25  ;;  %s2441_s18 = sshll.u32 %s3873_s17, 4  ;;  %s2443_s20 = sshll.u32 %s4096_s13, 4  ;;  %s2442_s18 = int_to_ptr.vmem [resolvable:$true] %s2441_s18  ;;  %s2444_s20 = int_to_ptr.hbm [resolvable:$true] %s2443_s20 }
  0x16   :  { %v3521_v32 = vld [vmem:[#allocation3 + $0xcc] sm:$0xf0]  ;;  %v2697_v33 = vld [vmem:[#allocation3 + $0x1c0] sm:$0xf]  ;;  %v2970_v44 = vor.u32 %v3621_v28, %v2969_v27 }
  0x17   :  { %v3553_v34 = vld [vmem:[#allocation3 + $0x1cc] sm:$0xf0]  ;;  %v2825_v40 = vld [vmem:[#allocation3 + $0x2c0] sm:$0xf]  ;;  %v2570_v49 = vor.u32 %v3521_v32, %v2569_v31 }
  0x18   :  { %v84_v3 = vld.sshfl [vmem:[#allocation1] sm:$0xff pattern:$0x73625140]  ;;  %v85_v4 = vld.sshfl [vmem:[#allocation1 + $0x8] sm:$0xff pattern:$0x73625140]  ;;  %v2698_v50 = vor.u32 %v3553_v34, %v2697_v33 }
  0x19   :  { %v93_v5 = vsel %vm92_vm0, %v84_v3, 0  ;;  %v95_v6 = vsel %vm92_vm0, %v85_v4, 0  ;;  %v86_v7 = vld.sshfl [vmem:[#allocation1 + $0x10] sm:$0xff pattern:$0x73625140] }
  0x1a   :  { %108 = vmatpush.bf16.msra.mxu0 %v93_v5  ;;  %121 = vmatpush.bf16.msra.mxu1 %v95_v6  ;;  %v97_v8 = vsel %vm92_vm0, %v86_v7, 0  ;;  %v87_v9 = vld.sshfl [vmem:[#allocation1 + $0x18] sm:$0xff pattern:$0x73625140]  ;;  %v2953_v47 = vld [vmem:[#allocation3 + $0x3c0] sm:$0xf] }
  0x1b   :  { %134 = vmatpush.bf16.msra.mxu2 %v97_v8  ;;  %v99_v11 = vsel %vm92_vm0, %v87_v9, 0  ;;  %156 = vst [vmem:[#allocation1] ss:$4 sm:$0xff] %v154_v2  ;;  %v3585_v45 = vld [vmem:[#allocation3 + $0x2cc] sm:$0xf0] }
  0x1c   :  { %147 = vmatpush.bf16.msra.mxu3 %v99_v11  ;;  %v3617_v48 = vld [vmem:[#allocation3 + $0x3cc] sm:$0xf0]  ;;  %v2553_v51 = vld [vmem:[#allocation3 + $0xa0] sm:$0xf]  ;;  %v2826_v55 = vor.u32 %v3585_v45, %v2825_v40  ;;  %v224_v5 = vld [vmem:[%s4085_s2] sm:$0xf] }
  0x1d   :  { %2459 = vmatmul.msk.bf16.vlgmr.msra.gmra.mxu0 %vm88_vm1, %v80_v10  ;;  %2460 = vmatmul.msk.bf16.vlgmr.msra.gmra.mxu1 %vm88_vm1, %v80_v10  ;;  %v3517_v52 = vld [vmem:[#allocation3 + $0xac] sm:$0xf0]  ;;  %v2681_v53 = vld [vmem:[#allocation3 + $0x1a0] sm:$0xf]  ;;  %v2954_v56 = vor.u32 %v3617_v48, %v2953_v47 }
  0x1e   :  { %2461 = vmatmul.msk.bf16.vlgmr.msra.gmra.mxu2 %vm88_vm1, %v80_v10  ;;  %v3549_v54 = vld [vmem:[#allocation3 + $0x1ac] sm:$0xf0]  ;;  %v2809_v57 = vld [vmem:[#allocation3 + $0x2a0] sm:$0xf]  ;;  %v2554_v61 = vor.u32 %v3517_v52, %v2553_v51  ;;  %v2587_v51 = vld [vmem:[#allocation3 + $0xf0] sm:$0xf0] }
  0x1f   :  { %2462 = vmatmul.msk.bf16.vlgmr.msra.gmra.mxu3 %vm88_vm1, %v80_v10  ;;  %v3581_v58 = vld [vmem:[#allocation3 + $0x2ac] sm:$0xf0]  ;;  %v2937_v59 = vld [vmem:[#allocation3 + $0x3a0] sm:$0xf]  ;;  %v2682_v62 = vor.u32 %v3549_v54, %v2681_v53  ;;  %v3555_v52 = vld [vmem:[#allocation3 + $0x1e4] sm:$0xf] }
  0x20   :  { %v3613_v60 = vld [vmem:[#allocation3 + $0x3ac] sm:$0xf0]  ;;  %v2810_v63 = vor.u32 %v3581_v58, %v2809_v57  ;;  %v2537_v1 = vld [vmem:[#allocation3 + $0x80] sm:$0xf]  ;;  %v2715_v53 = vld [vmem:[#allocation3 + $0x1f0] sm:$0xf0] }
  0x21   :  { %v2938_v0 = vor.u32 %v3613_v60, %v2937_v59  ;;  %v2665_v3 = vld [vmem:[#allocation3 + $0x180] sm:$0xf]  ;;  %v3545_v4 = vld [vmem:[#allocation3 + $0x18c] sm:$0xf0] }
  0x22   :  { %v157_v12 = vld.sshfl [vmem:[#allocation1] sm:$0xff pattern:$0x73625140]  ;;  %v158_v13 = vld.sshfl [vmem:[#allocation1 + $0x8] sm:$0xff pattern:$0x73625140]  ;;  %v2666_v7 = vor.u32 %v3545_v4, %v2665_v3 }
  0x23   :  { %v164_v14 = vsel %vm92_vm0, %v157_v12, 0  ;;  %v166_v15 = vsel %vm92_vm0, %v158_v13, 0  ;;  %v159_v16 = vld.sshfl [vmem:[#allocation1 + $0x10] sm:$0xff pattern:$0x73625140] }
  0x24   :  { %179 = vmatpush.bf16.msrb.mxu0 %v164_v14  ;;  %192 = vmatpush.bf16.msrb.mxu1 %v166_v15  ;;  %v168_v17 = vsel %vm92_vm0, %v159_v16, 0  ;;  %v160_v18 = vld.sshfl [vmem:[#allocation1 + $0x18] sm:$0xff pattern:$0x73625140]  ;;  %v2521_v8 = vld [vmem:[#allocation3 + $0x60] sm:$0xf] }
  0x25   :  { %205 = vmatpush.bf16.msrb.mxu2 %v168_v17  ;;  %v170_v19 = vsel %vm92_vm0, %v160_v18, 0  ;;  %225 = vst [vmem:[#allocation1] ss:$4 sm:$0xff] %v154_v2  ;;  %v3513_v2 = vld [vmem:[#allocation3 + $0x8c] sm:$0xf0] }
  0x26   :  { %218 = vmatpush.bf16.msrb.mxu3 %v170_v19  ;;  %v2538_v6 = vor.u32 %v3513_v2, %v2537_v1  ;;  %v3509_v9 = vld [vmem:[#allocation3 + $0x6c] sm:$0xf0]  ;;  %v2649_v10 = vld [vmem:[#allocation3 + $0x160] sm:$0xf]  ;;  %v2699_v2 = vld [vmem:[#allocation3 + $0x1d0] sm:$0xf0] }
  0x27   :  { %v3541_v11 = vld [vmem:[#allocation3 + $0x16c] sm:$0xf0]  ;;  %v2522_v12 = vor.u32 %v3509_v9, %v2521_v8  ;;  %v2793_v14 = vld [vmem:[#allocation3 + $0x280] sm:$0xf]  ;;  %v3587_v9 = vld [vmem:[#allocation3 + $0x2e4] sm:$0xf] }
  0x28   :  { %v2650_v13 = vor.u32 %v3541_v11, %v2649_v10  ;;  %v3577_v15 = vld [vmem:[#allocation3 + $0x28c] sm:$0xf0]  ;;  %v2921_v16 = vld [vmem:[#allocation3 + $0x380] sm:$0xf]  ;;  %v2843_v10 = vld [vmem:[#allocation3 + $0x2f0] sm:$0xf0] }
  0x29   :  { %v2794_v17 = vor.u32 %v3577_v15, %v2793_v14  ;;  %v3609_v18 = vld [vmem:[#allocation3 + $0x38c] sm:$0xf0]  ;;  %v2505_v19 = vld [vmem:[#allocation3 + $0x40] sm:$0xf]  ;;  %v2971_v14 = vld [vmem:[#allocation3 + $0x3f0] sm:$0xf0] }
  0x2a   :  { %v2922_v21 = vor.u32 %v3609_v18, %v2921_v16  ;;  %v2633_v23 = vld [vmem:[#allocation3 + $0x140] sm:$0xf]  ;;  %v3537_v24 = vld [vmem:[#allocation3 + $0x14c] sm:$0xf0]  ;;  %v3515_v16 = vld [vmem:[#allocation3 + $0xa4] sm:$0xf] }
  0x2b   :  { %v2777_v25 = vld [vmem:[#allocation3 + $0x260] sm:$0xf]  ;;  %v2634_v26 = vor.u32 %v3537_v24, %v2633_v23  ;;  %v3573_v27 = vld [vmem:[#allocation3 + $0x26c] sm:$0xf0]  ;;  %v3547_v18 = vld [vmem:[#allocation3 + $0x1a4] sm:$0xf] }
  0x2c   :  { %v226_v29 = vld.sshfl [vmem:[#allocation1] sm:$0xff pattern:$0x73625140]  ;;  %v227_v30 = vld.sshfl [vmem:[#allocation1 + $0x8] sm:$0xff pattern:$0x73625140] }
  0x2d   :  { %2463 = vmatmul.msk.bf16.vlgmr.msrb.gmra.mxu0 %vm88_vm1, %v153_v20  ;;  %2464 = vmatmul.msk.bf16.vlgmr.msrb.gmra.mxu1 %vm88_vm1, %v153_v20  ;;  %v233_v35 = vsel %vm92_vm0, %v226_v29, 0  ;;  %v235_v36 = vsel %vm92_vm0, %v227_v30, 0  ;;  %v228_v37 = vld.sshfl [vmem:[#allocation1 + $0x10] sm:$0xff pattern:$0x73625140]  ;;  %v2778_v30 = vor.u32 %v3573_v27, %v2777_v25 }
  0x2e   :  { %2465 = vmatmul.msk.bf16.vlgmr.msrb.gmra.mxu2 %vm88_vm1, %v153_v20  ;;  %248 = vmatpush.bf16.msra.mxu0 %v233_v35  ;;  %v237_v41 = vsel %vm92_vm0, %v228_v37, 0  ;;  %v229_v42 = vld.sshfl [vmem:[#allocation1 + $0x18] sm:$0xff pattern:$0x73625140]  ;;  %v2905_v28 = vld [vmem:[#allocation3 + $0x360] sm:$0xf] }
  0x2f   :  { %2466 = vmatmul.msk.bf16.vlgmr.msrb.gmra.mxu3 %vm88_vm1, %v153_v20  ;;  %261 = vmatpush.bf16.msra.mxu1 %v235_v36  ;;  %v239_v46 = vsel %vm92_vm0, %v229_v42, 0  ;;  %v3505_v20 = vld [vmem:[#allocation3 + $0x4c] sm:$0xf0]  ;;  %v2489_v32 = vld [vmem:[#allocation3 + $0x20] sm:$0xf] }
  0x30   :  { %274 = vmatpush.bf16.msra.mxu2 %v237_v41  ;;  %287 = vmatpush.bf16.msra.mxu3 %v239_v46  ;;  %v2506_v22 = vor.u32 %v3505_v20, %v2505_v19  ;;  %v3605_v29 = vld [vmem:[#allocation3 + $0x36c] sm:$0xf0]  ;;  %v2617_v34 = vld [vmem:[#allocation3 + $0x120] sm:$0xf]  ;;  %v2683_v20 = vld [vmem:[#allocation3 + $0x1b0] sm:$0xf0] }
  0x31   :  { %v2906_v31 = vor.u32 %v3605_v29, %v2905_v28  ;;  %v3501_v33 = vld [vmem:[#allocation3 + $0x2c] sm:$0xf0]  ;;  %v2889_v40 = vld [vmem:[#allocation3 + $0x340] sm:$0xf]  ;;  %v2686_v23 = vor.u32 %v3547_v18, %v2683_v20  ;;  %v3615_v25 = vld [vmem:[#allocation3 + $0x3c4] sm:$0xf] }
  0x32   :  { %1109 = vmatpush.bf16.msrb.mxu0 %v2586_v38  ;;  %v2490_v35 = vor.u32 %v3501_v33, %v2489_v32  ;;  %v3533_v36 = vld [vmem:[#allocation3 + $0x12c] sm:$0xf0]  ;;  %v2761_v38 = vld [vmem:[#allocation3 + $0x240] sm:$0xf]  ;;  %v3511_v28 = vld [vmem:[#allocation3 + $0x84] sm:$0xf] }
  0x33   :  { %1123 = vmatpush.bf16.msrb.mxu1 %v2714_v39  ;;  %v2618_v37 = vor.u32 %v3533_v36, %v2617_v34  ;;  %v3569_v39 = vld [vmem:[#allocation3 + $0x24c] sm:$0xf0]  ;;  %v2601_v47 = vld [vmem:[#allocation3 + $0x100] sm:$0xf]  ;;  %v2539_v29 = vld [vmem:[#allocation3 + $0x90] sm:$0xf0] }
  0x34   :  { %1137 = vmatpush.bf16.msrb.mxu2 %v2842_v43  ;;  %1151 = vmatpush.bf16.msrb.mxu3 %v2970_v44  ;;  %v2762_v41 = vor.u32 %v3569_v39, %v2761_v38  ;;  %v3601_v42 = vld [vmem:[#allocation3 + $0x34c] sm:$0xf0]  ;;  %v2473_v43 = vld [vmem:[#allocation3] sm:$0xf]  ;;  %v2667_v32 = vld [vmem:[#allocation3 + $0x190] sm:$0xf0] }
  0x35   :  { %v3497_v44 = vld [vmem:[#allocation3 + $0xc] sm:$0xf0]  ;;  %v2890_v45 = vor.u32 %v3601_v42, %v2889_v40  ;;  %v2873_v58 = vld [vmem:[#allocation3 + $0x320] sm:$0xf]  ;;  %v3579_v34 = vld [vmem:[#allocation3 + $0x2a4] sm:$0xf] }
  0x36   :  { %1110 = vmatpush.bf16.msrb.mxu0 %v2570_v49  ;;  %v2474_v46 = vor.u32 %v3497_v44, %v2473_v43  ;;  %v3529_v48 = vld [vmem:[#allocation3 + $0x10c] sm:$0xf0]  ;;  %v3523_v49 = vld [vmem:[#allocation3 + $0xe4] sm:$0xf]  ;;  %v2729_v3 = vld [vmem:[#allocation3 + $0x200] sm:$0xf] }
  0x37   :  { %1124 = vmatpush.bf16.msrb.mxu1 %v2698_v50  ;;  %v2602_v50 = vor.u32 %v3529_v48, %v2601_v47  ;;  %v2590_v54 = vor.u32 %v3523_v49, %v2587_v51  ;;  %v3565_v57 = vld [vmem:[#allocation3 + $0x22c] sm:$0xf0]  ;;  %v2939_v38 = vld [vmem:[#allocation3 + $0x3b0] sm:$0xf0]  ;;  %v3507_v40 = vld [vmem:[#allocation3 + $0x64] sm:$0xf] }
  0x38   :  { %1138 = vmatpush.bf16.msrb.mxu2 %v2826_v55  ;;  %1152 = vmatpush.bf16.msrb.mxu3 %v2954_v56  ;;  %v2718_v55 = vor.u32 %v3555_v52, %v2715_v53  ;;  %v2745_v56 = vld [vmem:[#allocation3 + $0x220] sm:$0xf]  ;;  %v3597_v60 = vld [vmem:[#allocation3 + $0x32c] sm:$0xf0]  ;;  %v3539_v42 = vld [vmem:[#allocation3 + $0x164] sm:$0xf] }
  0x39   :  { %v2746_v59 = vor.u32 %v3565_v57, %v2745_v56  ;;  %v3593_v8 = vld [vmem:[#allocation3 + $0x30c] sm:$0xf0]  ;;  %v2651_v44 = vld [vmem:[#allocation3 + $0x170] sm:$0xf0]  ;;  %v3607_v48 = vld [vmem:[#allocation3 + $0x384] sm:$0xf] }
  0x3a   :  { %1111 = vmatpush.bf16.msrb.mxu0 %v2554_v61  ;;  %v2874_v61 = vor.u32 %v3597_v60, %v2873_v58  ;;  %v2795_v47 = vld [vmem:[#allocation3 + $0x290] sm:$0xf0]  ;;  %v3503_v52 = vld [vmem:[#allocation3 + $0x44] sm:$0xf] }
  0x3b   :  { %1125 = vmatpush.bf16.msrb.mxu1 %v2682_v62  ;;  %v3519_v62 = vld [vmem:[#allocation3 + $0xc4] sm:$0xf]  ;;  %v2507_v53 = vld [vmem:[#allocation3 + $0x50] sm:$0xf0] }
  0x3c   :  { %1139 = vmatpush.bf16.msrb.mxu2 %v2810_v63  ;;  %1153 = vmatpush.bf16.msrb.mxu3 %v2938_v0  ;;  %v2571_v63 = vld [vmem:[#allocation3 + $0xd0] sm:$0xf0]  ;;  %v3551_v0 = vld [vmem:[#allocation3 + $0x1c4] sm:$0xf]  ;;  %v2510_v57 = vor.u32 %v3503_v52, %v2507_v53 }
  0x3d   :  { %2467 = vmatmul.msk.bf16.vlgmr.msra.gmra.mxu0 %vm88_vm1, %v224_v5  ;;  %2468 = vmatmul.msk.bf16.vlgmr.msra.gmra.mxu1 %vm88_vm1, %v224_v5  ;;  %v2574_v1 = vor.u32 %v3519_v62, %v2571_v63  ;;  %v2702_v4 = vor.u32 %v3551_v0, %v2699_v2  ;;  %v2635_v58 = vld [vmem:[#allocation3 + $0x150] sm:$0xf0]  ;;  %v3571_v60 = vld [vmem:[#allocation3 + $0x264] sm:$0xf] }
  0x3e   :  { %2469 = vmatmul.msk.bf16.vlgmr.msra.gmra.mxu2 %vm88_vm1, %v224_v5  ;;  %1112 = vmatpush.bf16.msrb.mxu0 %v2538_v6  ;;  %v2857_v6 = vld [vmem:[#allocation3 + $0x300] sm:$0xf]  ;;  %v3603_v62 = vld [vmem:[#allocation3 + $0x364] sm:$0xf]  ;;  %v2907_v0 = vld [vmem:[#allocation3 + $0x370] sm:$0xf0] }
  0x3f   :  { %2470 = vmatmul.msk.bf16.vlgmr.msra.gmra.mxu3 %vm88_vm1, %v224_v5  ;;  %1126 = vmatpush.bf16.msrb.mxu1 %v2666_v7  ;;  %v3561_v5 = vld [vmem:[#allocation3 + $0x20c] sm:$0xf0]  ;;  %v2858_v11 = vor.u32 %v3593_v8, %v2857_v6  ;;  %v3499_v2 = vld [vmem:[#allocation3 + $0x24] sm:$0xf]  ;;  %v2619_v6 = vld [vmem:[#allocation3 + $0x130] sm:$0xf0] }
  0x40   :  { %1140 = vmatpush.bf16.msrb.mxu2 %v2794_v17  ;;  %1154 = vmatpush.bf16.msrb.mxu3 %v2922_v21  ;;  %v2730_v7 = vor.u32 %v3561_v5, %v2729_v3  ;;  %v2555_v17 = vld [vmem:[#allocation3 + $0xb0] sm:$0xf0]  ;;  %v3583_v21 = vld [vmem:[#allocation3 + $0x2c4] sm:$0xf] }
  0x41   :  { %v2558_v19 = vor.u32 %v3515_v16, %v2555_v17  ;;  %v2491_v3 = vld [vmem:[#allocation3 + $0x30] sm:$0xf0]  ;;  %v3567_v8 = vld [vmem:[#allocation3 + $0x244] sm:$0xf] }
  0x42   :  { %1113 = vmatpush.bf16.msrb.mxu0 %v2522_v12  ;;  %v2846_v12 = vor.u32 %v3587_v9, %v2843_v10  ;;  %v2494_v5 = vor.u32 %v3499_v2, %v2491_v3  ;;  %v2763_v9 = vld [vmem:[#allocation3 + $0x250] sm:$0xf0]  ;;  %v3599_v10 = vld [vmem:[#allocation3 + $0x344] sm:$0xf]  ;;  %v3558_v2 = vld [vmem:[#allocation3 + $0x1f4] sm:$0xf0] }
  0x43   :  { %1127 = vmatpush.bf16.msrb.mxu1 %v2650_v13  ;;  %v3619_v13 = vld [vmem:[#allocation3 + $0x3e4] sm:$0xf]  ;;  %v2475_v16 = vld [vmem:[#allocation3 + $0x10] sm:$0xf0] }
  0x44   :  { %1141 = vmatpush.bf16.msrb.mxu2 %v2778_v30  ;;  %1155 = vmatpush.bf16.msrb.mxu3 %v2906_v31  ;;  %v2974_v15 = vor.u32 %v3619_v13, %v2971_v14  ;;  %v3543_v30 = vld [vmem:[#allocation3 + $0x184] sm:$0xf]  ;;  %v2542_v31 = vor.u32 %v3511_v28, %v2539_v29 }
  0x45   :  { %v2670_v33 = vor.u32 %v3543_v30, %v2667_v32  ;;  %v3527_v17 = vld [vmem:[#allocation3 + $0x104] sm:$0xf] }
  0x46   :  { %1114 = vmatpush.bf16.msrb.mxu0 %v2506_v22  ;;  %v2827_v22 = vld [vmem:[#allocation3 + $0x2d0] sm:$0xf0]  ;;  %v3559_v30 = vld [vmem:[#allocation3 + $0x204] sm:$0xf] }
  0x47   :  { %1128 = vmatpush.bf16.msrb.mxu1 %v2634_v26  ;;  %v2830_v24 = vor.u32 %v3583_v21, %v2827_v22  ;;  %v2955_v26 = vld [vmem:[#allocation3 + $0x3d0] sm:$0xf0] }
  0x48   :  { %1142 = vmatpush.bf16.msrb.mxu2 %v2762_v41  ;;  %1156 = vmatpush.bf16.msrb.mxu3 %v2890_v45  ;;  %v2958_v27 = vor.u32 %v3615_v25, %v2955_v26  ;;  %v2523_v41 = vld [vmem:[#allocation3 + $0x70] sm:$0xf0]  ;;  %v2654_v45 = vor.u32 %v3539_v42, %v2651_v44  ;;  %v3595_v26 = vld [vmem:[#allocation3 + $0x324] sm:$0xf] }
  0x49   :  { %v2526_v43 = vor.u32 %v3507_v40, %v2523_v41  ;;  %v2603_v21 = vld [vmem:[#allocation3 + $0x110] sm:$0xf0] }
  0x4a   :  { %1115 = vmatpush.bf16.msrb.mxu0 %v2490_v35  ;;  %v2811_v35 = vld [vmem:[#allocation3 + $0x2b0] sm:$0xf0] }
  0x4b   :  { %1129 = vmatpush.bf16.msrb.mxu1 %v2618_v37  ;;  %v2814_v36 = vor.u32 %v3579_v34, %v2811_v35  ;;  %v3611_v37 = vld [vmem:[#allocation3 + $0x3a4] sm:$0xf]  ;;  %v2747_v25 = vld [vmem:[#allocation3 + $0x230] sm:$0xf0] }
  0x4c   :  { %1143 = vmatpush.bf16.msrb.mxu2 %v2746_v59  ;;  %1157 = vmatpush.bf16.msrb.mxu3 %v2874_v61  ;;  %v2942_v39 = vor.u32 %v3611_v37, %v2939_v38  ;;  %v2779_v61 = vld [vmem:[#allocation3 + $0x270] sm:$0xf0] }
  0x4d   :  { %v2782_v63 = vor.u32 %v3571_v60, %v2779_v61  ;;  %v2859_v34 = vld [vmem:[#allocation3 + $0x310] sm:$0xf0]  ;;  %v2593_v60 = vld [vmem:[#allocation3 + $0xe8] sm:$0xf]  ;;  %v3526_v61 = vld [vmem:[#allocation3 + $0xf4] sm:$0xf0] }
  0x4e   :  { %1116 = vmatpush.bf16.msrb.mxu0 %v2474_v46  ;;  %v3575_v46 = vld [vmem:[#allocation3 + $0x284] sm:$0xf]  ;;  %v293_v44 = vld [vmem:[%s4088_s5] sm:$0xf] }
  0x4f   :  { %1130 = vmatpush.bf16.msrb.mxu1 %v2602_v50  ;;  %v2798_v49 = vor.u32 %v3575_v46, %v2795_v47  ;;  %v2923_v50 = vld [vmem:[#allocation3 + $0x390] sm:$0xf0]  ;;  %v299_v46 = vperm.slane %v293_v44, 0 }
  0x50   :  { %1144 = vmatpush.bf16.msrb.mxu2 %v2730_v7  ;;  %1158 = vmatpush.bf16.msrb.mxu3 %v2858_v11  ;;  %v2926_v51 = vor.u32 %v3607_v48, %v2923_v50  ;;  %v2766_v11 = vor.u32 %v3567_v8, %v2763_v9  ;;  %v300_v48 = vperm.slane %v293_v44, 1  ;;  %v2594_v8 = vor.u32 %v3526_v61, %v2593_v60  ;;  %v2817_v60 = vld [vmem:[#allocation3 + $0x2a8] sm:$0xf]  ;;  %v3582_v61 = vld [vmem:[#allocation3 + $0x2b4] sm:$0xf0] }
  0x52   :  { %1165 = vmatpush.bf16.msra.mxu0 %v2590_v54  ;;  %v3535_v54 = vld [vmem:[#allocation3 + $0x144] sm:$0xf] }
  0x53   :  { %1179 = vmatpush.bf16.msra.mxu1 %v2718_v55  ;;  %v2638_v59 = vor.u32 %v3535_v54, %v2635_v58 }
  0x54   :  { %1193 = vmatpush.bf16.msra.mxu2 %v2846_v12  ;;  %1207 = vmatpush.bf16.msra.mxu3 %v2974_v15  ;;  %v2891_v12 = vld [vmem:[#allocation3 + $0x350] sm:$0xf0]  ;;  %v3495_v15 = vld [vmem:[#allocation3 + $0x4] sm:$0xf] }
  0x55   :  { %v2894_v14 = vor.u32 %v3599_v10, %v2891_v12  ;;  %v2478_v20 = vor.u32 %v3495_v15, %v2475_v16  ;;  %v3522_v12 = vld [vmem:[#allocation3 + $0xd4] sm:$0xf0] }
  0x56   :  { %1166 = vmatpush.bf16.msra.mxu0 %v2574_v1  ;;  %v2910_v1 = vor.u32 %v3603_v62, %v2907_v0 }
  0x57   :  { %1180 = vmatpush.bf16.msra.mxu1 %v2702_v4  ;;  %v3531_v4 = vld [vmem:[#allocation3 + $0x124] sm:$0xf] }
  0x58   :  { %1194 = vmatpush.bf16.msra.mxu2 %v2830_v24  ;;  %1208 = vmatpush.bf16.msra.mxu3 %v2958_v27  ;;  %v2622_v7 = vor.u32 %v3531_v4, %v2619_v6  ;;  %v3563_v24 = vld [vmem:[#allocation3 + $0x224] sm:$0xf]  ;;  %v2875_v27 = vld [vmem:[#allocation3 + $0x330] sm:$0xf0] }
  0x59   :  { %v2750_v28 = vor.u32 %v3563_v24, %v2747_v25  ;;  %v2878_v29 = vor.u32 %v3595_v26, %v2875_v27  ;;  %v2849_v27 = vld [vmem:[#allocation3 + $0x2e8] sm:$0xf] }
  0x5a   :  { %1167 = vmatpush.bf16.msra.mxu0 %v2558_v19 }
  0x5b   :  { %1181 = vmatpush.bf16.msra.mxu1 %v2686_v23  ;;  %v2606_v23 = vor.u32 %v3527_v17, %v2603_v21  ;;  %v3554_v21 = vld [vmem:[#allocation3 + $0x1d4] sm:$0xf0] }
  0x5c   :  { %1195 = vmatpush.bf16.msra.mxu2 %v2814_v36  ;;  %1209 = vmatpush.bf16.msra.mxu3 %v2942_v39 }
  0x5e   :  { %1168 = vmatpush.bf16.msra.mxu0 %v2542_v31  ;;  %v2731_v31 = vld [vmem:[#allocation3 + $0x210] sm:$0xf0] }
  0x5f   :  { %1182 = vmatpush.bf16.msra.mxu1 %v2670_v33  ;;  %v2734_v32 = vor.u32 %v3559_v30, %v2731_v31  ;;  %v3591_v33 = vld [vmem:[#allocation3 + $0x304] sm:$0xf]  ;;  %v3622_v31 = vld [vmem:[#allocation3 + $0x3f4] sm:$0xf0] }
  0x60   :  { %1196 = vmatpush.bf16.msra.mxu2 %v2798_v49  ;;  %1210 = vmatpush.bf16.msra.mxu3 %v2926_v51  ;;  %v2862_v36 = vor.u32 %v3591_v33, %v2859_v34  ;;  %v3518_v33 = vld [vmem:[#allocation3 + $0xb4] sm:$0xf0] }
  0x62   :  { %1169 = vmatpush.bf16.msra.mxu0 %v2526_v43 }
  0x63   :  { %1183 = vmatpush.bf16.msra.mxu1 %v2654_v45 }
  0x64   :  { %1197 = vmatpush.bf16.msra.mxu2 %v2782_v63  ;;  %1211 = vmatpush.bf16.msra.mxu3 %v2910_v1  ;;  %v301_v63 = vperm.slane %v293_v44, 2  ;;  %v2721_v1 = vld [vmem:[#allocation3 + $0x1e8] sm:$0xf] }
  0x65   :  { %v2722_v10 = vor.u32 %v3558_v2, %v2721_v1  ;;  %v2529_v1 = vld [vmem:[#allocation3 + $0x68] sm:$0xf]  ;;  %v3510_v2 = vld [vmem:[#allocation3 + $0x74] sm:$0xf0] }
  0x66   :  { %1170 = vmatpush.bf16.msra.mxu0 %v2510_v57 }
  0x67   :  { %1184 = vmatpush.bf16.msra.mxu1 %v2638_v59 }
  0x68   :  { %1198 = vmatpush.bf16.msra.mxu2 %v2766_v11  ;;  %1212 = vmatpush.bf16.msra.mxu3 %v2894_v14  ;;  %v2577_v11 = vld [vmem:[#allocation3 + $0xc8] sm:$0xf] }
  0x69   :  { %v2578_v26 = vor.u32 %v3522_v12, %v2577_v11  ;;  %v3610_v11 = vld [vmem:[#allocation3 + $0x394] sm:$0xf0]  ;;  %v2513_v12 = vld [vmem:[#allocation3 + $0x48] sm:$0xf] }
  0x6a   :  { %1171 = vmatpush.bf16.msra.mxu0 %v2494_v5  ;;  %v302_v5 = vperm.slane %v293_v44, 3  ;;  %v3586_v44 = vld [vmem:[#allocation3 + $0x2d4] sm:$0xf0] }
  0x6b   :  { %1185 = vmatpush.bf16.msra.mxu1 %v2622_v7 }
  0x6c   :  { %1199 = vmatpush.bf16.msra.mxu2 %v2750_v28  ;;  %1213 = vmatpush.bf16.msra.mxu3 %v2878_v29  ;;  %v3590_v28 = vld [vmem:[#allocation3 + $0x2f4] sm:$0xf0]  ;;  %v2977_v29 = vld [vmem:[#allocation3 + $0x3e8] sm:$0xf] }
  0x6e   :  { %1172 = vmatpush.bf16.msra.mxu0 %v2478_v20  ;;  %v2705_v20 = vld [vmem:[#allocation3 + $0x1c8] sm:$0xf] }
  0x6f   :  { %1186 = vmatpush.bf16.msra.mxu1 %v2606_v23 }
  0x70   :  { %1200 = vmatpush.bf16.msra.mxu2 %v2734_v32  ;;  %1214 = vmatpush.bf16.msra.mxu3 %v2862_v36  ;;  %v2561_v32 = vld [vmem:[#allocation3 + $0xa8] sm:$0xf]  ;;  %v3550_v36 = vld [vmem:[#allocation3 + $0x1b4] sm:$0xf0] }
  0x9a   :  { %v3992_v55 = vpop.f32.mrf.mxu0  ;;  %v3994_v56 = vpop.f32.mrf.mxu1 }
  0xa1   :  { %v3996_v13 = vpop.f32.mrf.mxu2 }
  0xa2   :  { %v3998_v18 = vpop.f32.mrf.mxu3  ;;  %v112_v19 = vpop.f32.mrf.mxu0 }
  0xa3   :  { %v125_v22 = vpop.f32.mrf.mxu1 }
  0xa9   :  { %v138_v35 = vpop.f32.mrf.mxu2 }
  0xaa   :  { %v151_v37 = vpop.f32.mrf.mxu3  ;;  %v181_v38 = vpop.f32.mrf.mxu0 }
  0xab   :  { %v194_v39 = vpop.f32.mrf.mxu1  ;;  %v294_v45 = vadd.f32 %v181_v38, %v3992_v55 }
  0xac   :  { %v295_v47 = vadd.f32 %v194_v39, %v3994_v56  ;;  %v2850_v39 = vor.u32 %v3590_v28, %v2849_v27  ;;  %v2497_v27 = vld [vmem:[#allocation3 + $0x28] sm:$0xf]  ;;  %v3502_v28 = vld [vmem:[#allocation3 + $0x34] sm:$0xf0] }
  0xad   :  { %v307_v52 = vadd.f32 %v299_v46, %v294_v45  ;;  %v2961_v45 = vld [vmem:[#allocation3 + $0x3c8] sm:$0xf] }
  0xae   :  { %v308_v57 = vadd.f32 %v300_v48, %v295_v47 }
  0xaf   :  { %v319_v3 = vmax.f32 %v307_v52, 0.0 }
  0xb0   :  { %v320_v7 = vmax.f32 %v308_v57, 0.0 }
  0xb1   :  { %v207_v40 = vpop.f32.mrf.mxu2 }
  0xb2   :  { %v220_v41 = vpop.f32.mrf.mxu3  ;;  %v183_v42 = vpop.f32.mrf.mxu0  ;;  %v296_v62 = vadd.f32 %v207_v40, %v3996_v13 }
  0xb3   :  { %v196_v43 = vpop.f32.mrf.mxu1  ;;  %v297_v4 = vadd.f32 %v220_v41, %v3998_v18  ;;  %v2978_v41 = vor.u32 %v3622_v31, %v2977_v29  ;;  %v2562_v42 = vor.u32 %v3518_v33, %v2561_v32  ;;  %v2625_v29 = vld [vmem:[#allocation3 + $0x128] sm:$0xf]  ;;  %v3570_v33 = vld [vmem:[#allocation3 + $0x254] sm:$0xf0] }
  0xb4   :  { %v309_v14 = vadd.f32 %v301_v63, %v296_v62  ;;  %v2833_v43 = vld [vmem:[#allocation3 + $0x2c8] sm:$0xf] }
  0xb5   :  { %v310_v22 = vadd.f32 %v302_v5, %v297_v4  ;;  %v2834_v57 = vor.u32 %v3586_v44, %v2833_v43  ;;  %v3542_v4 = vld [vmem:[#allocation3 + $0x174] sm:$0xf0]  ;;  %v2769_v32 = vld [vmem:[#allocation3 + $0x248] sm:$0xf]  ;;  %v2595_v44 = vld [vmem:[#allocation3 + $0xf8] sm:$0xf0] }
  0xb6   :  { %v321_v34 = vmax.f32 %v309_v14, 0.0  ;;  %v3506_v14 = vld [vmem:[#allocation3 + $0x54] sm:$0xf0]  ;;  %v2770_v43 = vor.u32 %v3570_v33, %v2769_v32  ;;  %v3580_v32 = vld [vmem:[#allocation3 + $0x2ac] sm:$0xf] }
  0xb7   :  { %v322_v37 = vmax.f32 %v310_v22, 0.0  ;;  %v3574_v22 = vld [vmem:[#allocation3 + $0x274] sm:$0xf0]  ;;  %v2819_v33 = vld [vmem:[#allocation3 + $0x2b8] sm:$0xf0] }
  0xb9   :  { %v209_v49 = vpop.f32.mrf.mxu2 }
  0xba   :  { %v222_v50 = vpop.f32.mrf.mxu3  ;;  %v250_v51 = vpop.f32.mrf.mxu0  ;;  %v3618_v49 = vld [vmem:[#allocation3 + $0x3d4] sm:$0xf0] }
  0xbb   :  { %v311_v53 = vadd.f32 %v250_v51, %v3992_v55  ;;  %v263_v54 = vpop.f32.mrf.mxu1  ;;  %v2545_v50 = vld [vmem:[#allocation3 + $0x88] sm:$0xf]  ;;  %v3514_v51 = vld [vmem:[#allocation3 + $0x94] sm:$0xf0] }
  0xbc   :  { %v312_v58 = vadd.f32 %v263_v54, %v3994_v56  ;;  %v3546_v54 = vld [vmem:[#allocation3 + $0x194] sm:$0xf0] }
  0xbd   :  { %v315_v59 = vadd.f32 %v311_v53, %v299_v46  ;;  %v2673_v53 = vld [vmem:[#allocation3 + $0x188] sm:$0xf] }
  0xbe   :  { %v316_v0 = vadd.f32 %v312_v58, %v300_v48  ;;  %v2962_v58 = vor.u32 %v3618_v49, %v2961_v45  ;;  %v2674_v62 = vor.u32 %v3546_v54, %v2673_v53  ;;  %v3556_v45 = vld [vmem:[#allocation3 + $0x1ec] sm:$0xf]  ;;  %v2753_v49 = vld [vmem:[#allocation3 + $0x228] sm:$0xf]  ;;  %v3598_v54 = vld [vmem:[#allocation3 + $0x334] sm:$0xf0] }
  0xbf   :  { %v323_v6 = vmax.f32 %v315_v59, 0.0  ;;  %v2546_v59 = vor.u32 %v3514_v51, %v2545_v50  ;;  %v3566_v50 = vld [vmem:[#allocation3 + $0x234] sm:$0xf0]  ;;  %v2881_v53 = vld [vmem:[#allocation3 + $0x328] sm:$0xf] }
  0xc0   :  { %v324_v55 = vmax.f32 %v316_v0, 0.0  ;;  %v3614_v0 = vld [vmem:[#allocation3 + $0x3b4] sm:$0xf0] }
  0xc1   :  { %v4009_v9 = vpack.c.bf16 %v323_v6, %v319_v3  ;;  %v276_v56 = vpop.f32.mrf.mxu2  ;;  %v2657_v3 = vld [vmem:[#allocation3 + $0x168] sm:$0xf] }
  0xc2   :  { %v4011_v15 = vpack.c.bf16 %v324_v55, %v320_v7  ;;  %v313_v16 = vadd.f32 %v276_v56, %v3996_v13  ;;  %v289_v17 = vpop.f32.mrf.mxu3  ;;  %v252_v19 = vpop.f32.mrf.mxu0  ;;  %v2706_v13 = vor.u32 %v3554_v21, %v2705_v20  ;;  %v2801_v7 = vld [vmem:[#allocation3 + $0x288] sm:$0xf]  ;;  %v3578_v55 = vld [vmem:[#allocation3 + $0x294] sm:$0xf0]  ;;  %v2658_v56 = vor.u32 %v3542_v4, %v2657_v3 }
  0xc3   :  { %v314_v23 = vadd.f32 %v289_v17, %v3998_v18  ;;  %1117 = vmatmul.bf16.vlgmr.msrb.gmra.mxu0 %v4009_v9  ;;  %v265_v24 = vpop.f32.mrf.mxu1  ;;  %v2689_v18 = vld [vmem:[#allocation3 + $0x1a8] sm:$0xf]  ;;  %v3538_v17 = vld [vmem:[#allocation3 + $0x154] sm:$0xf0]  ;;  %v2802_v19 = vor.u32 %v3578_v55, %v2801_v7 }
  0xc4   :  { %v317_v25 = vadd.f32 %v313_v16, %v301_v63  ;;  %1131 = vmatmul.bf16.vlgmr.msrb.gmra.mxu1 %v4011_v15  ;;  %1221 = vmatpush.bf16.msrb.mxu0 %v2594_v8  ;;  %v2690_v48 = vor.u32 %v3550_v36, %v2689_v18  ;;  %v2945_v63 = vld [vmem:[#allocation3 + $0x3a8] sm:$0xf]  ;;  %v2530_v8 = vor.u32 %v3510_v2, %v2529_v1  ;;  %v3602_v36 = vld [vmem:[#allocation3 + $0x354] sm:$0xf0] }
  0xc5   :  { %v318_v30 = vadd.f32 %v314_v23, %v302_v5  ;;  %1235 = vmatpush.bf16.msrb.mxu1 %v2722_v10  ;;  %v2818_v5 = vor.u32 %v3582_v61, %v2817_v60  ;;  %v2946_v6 = vor.u32 %v3614_v0, %v2945_v63  ;;  %v2929_v10 = vld [vmem:[#allocation3 + $0x388] sm:$0xf]  ;;  %v2514_v23 = vor.u32 %v3506_v14, %v2513_v12  ;;  %v2579_v61 = vld [vmem:[#allocation3 + $0xd8] sm:$0xf0]  ;;  %v3562_v2 = vld [vmem:[#allocation3 + $0x214] sm:$0xf0] }
  0xc6   :  { %v325_v35 = vmax.f32 %v317_v25, 0.0  ;;  %v2641_v16 = vld [vmem:[#allocation3 + $0x148] sm:$0xf]  ;;  %v2930_v20 = vor.u32 %v3610_v11, %v2929_v10  ;;  %v2754_v60 = vor.u32 %v3566_v50, %v2753_v49  ;;  %v2707_v63 = vld [vmem:[#allocation3 + $0x1d8] sm:$0xf0]  ;;  %v2882_v0 = vor.u32 %v3598_v54, %v2881_v53 }
  0xc7   :  { %v326_v38 = vmax.f32 %v318_v30, 0.0  ;;  %v2785_v21 = vld [vmem:[#allocation3 + $0x268] sm:$0xf]  ;;  %v2642_v24 = vor.u32 %v3538_v17, %v2641_v16  ;;  %v3534_v30 = vld [vmem:[#allocation3 + $0x134] sm:$0xf0] }
  0xc8   :  { %v4017_v40 = vpack.c.bf16 %v325_v35, %v321_v34  ;;  %1222 = vmatpush.bf16.msrb.mxu0 %v2578_v26  ;;  %v2913_v25 = vld [vmem:[#allocation3 + $0x368] sm:$0xf]  ;;  %v3606_v26 = vld [vmem:[#allocation3 + $0x374] sm:$0xf0]  ;;  %v2498_v35 = vor.u32 %v3502_v28, %v2497_v27  ;;  %v2626_v18 = vor.u32 %v3534_v30, %v2625_v29  ;;  %v3516_v10 = vld [vmem:[#allocation3 + $0xac] sm:$0xf] }
  0xc9   :  { %v4019_v46 = vpack.c.bf16 %v326_v38, %v322_v37  ;;  %1236 = vmatpush.bf16.msrb.mxu1 %v2706_v13  ;;  %v278_v47 = vpop.f32.mrf.mxu2  ;;  %v2786_v13 = vor.u32 %v3574_v22, %v2785_v21  ;;  %v2914_v31 = vor.u32 %v3606_v26, %v2913_v25  ;;  %v2897_v34 = vld [vmem:[#allocation3 + $0x348] sm:$0xf]  ;;  %v3498_v38 = vld [vmem:[#allocation3 + $0x14] sm:$0xf0]  ;;  %v2563_v12 = vld [vmem:[#allocation3 + $0xb8] sm:$0xf0] }
  0xca   :  { %v291_v52 = vpop.f32.mrf.mxu3  ;;  %1145 = vmatmul.bf16.vlgmr.msrb.gmra.mxu2 %v4017_v40  ;;  %v2481_v37 = vld [vmem:[#allocation3 + $0x8] sm:$0xf]  ;;  %v2723_v47 = vld [vmem:[#allocation3 + $0x1f8] sm:$0xf0]  ;;  %v3594_v4 = vld [vmem:[#allocation3 + $0x314] sm:$0xf0] }
  0xcb   :  { %1159 = vmatmul.bf16.vlgmr.msrb.gmra.mxu3 %v4019_v46  ;;  %1249 = vmatpush.bf16.msrb.mxu2 %v2850_v39  ;;  %v2609_v39 = vld [vmem:[#allocation3 + $0x108] sm:$0xf]  ;;  %v2482_v51 = vor.u32 %v3498_v38, %v2481_v37  ;;  %v3548_v14 = vld [vmem:[#allocation3 + $0x1ac] sm:$0xf]  ;;  %v2691_v16 = vld [vmem:[#allocation3 + $0x1b8] sm:$0xf0] }
  0xcc   :  { %1263 = vmatpush.bf16.msrb.mxu3 %v2978_v41  ;;  %1223 = vmatpush.bf16.msrb.mxu0 %v2562_v42  ;;  %v3530_v41 = vld [vmem:[#allocation3 + $0x114] sm:$0xf0]  ;;  %v3524_v42 = vld [vmem:[#allocation3 + $0xec] sm:$0xf]  ;;  %v2737_v1 = vld [vmem:[#allocation3 + $0x208] sm:$0xf] }
  0xcd   :  { %1237 = vmatpush.bf16.msrb.mxu1 %v2690_v48  ;;  %v2898_v48 = vor.u32 %v3602_v36, %v2897_v34  ;;  %v2610_v52 = vor.u32 %v3530_v41, %v2609_v39  ;;  %v2865_v3 = vld [vmem:[#allocation3 + $0x308] sm:$0xf]  ;;  %v2738_v11 = vor.u32 %v3562_v2, %v2737_v1  ;;  %v3584_v21 = vld [vmem:[#allocation3 + $0x2cc] sm:$0xf]  ;;  %v2835_v22 = vld [vmem:[#allocation3 + $0x2d8] sm:$0xf0] }
  0xce   :  { %v2866_v17 = vor.u32 %v3594_v4, %v2865_v3  ;;  %v3616_v25 = vld [vmem:[#allocation3 + $0x3cc] sm:$0xf]  ;;  %v2963_v26 = vld [vmem:[#allocation3 + $0x3d8] sm:$0xf0] }
  0xcf   :  { %1250 = vmatpush.bf16.msrb.mxu2 %v2834_v57  ;;  %v2598_v57 = vor.u32 %v3524_v42, %v2595_v44  ;;  %v3512_v27 = vld [vmem:[#allocation3 + $0x8c] sm:$0xf]  ;;  %v2547_v28 = vld [vmem:[#allocation3 + $0x98] sm:$0xf0]  ;;  %v2822_v42 = vor.u32 %v3580_v32, %v2819_v33 }
  0xd0   :  { %1264 = vmatpush.bf16.msrb.mxu3 %v2962_v58  ;;  %1224 = vmatpush.bf16.msrb.mxu0 %v2546_v59  ;;  %v2726_v58 = vor.u32 %v3556_v45, %v2723_v47  ;;  %v3520_v59 = vld [vmem:[#allocation3 + $0xcc] sm:$0xf]  ;;  %v2675_v30 = vld [vmem:[#allocation3 + $0x198] sm:$0xf0]  ;;  %v2550_v34 = vor.u32 %v3512_v27, %v2547_v28 }
  0xd1   :  { %1238 = vmatpush.bf16.msrb.mxu1 %v2674_v62  ;;  %v3552_v62 = vld [vmem:[#allocation3 + $0x1cc] sm:$0xf]  ;;  %v2582_v7 = vor.u32 %v3520_v59, %v2579_v61  ;;  %v2947_v36 = vld [vmem:[#allocation3 + $0x3b8] sm:$0xf0] }
  0xd2   :  { %v2710_v55 = vor.u32 %v3552_v62, %v2707_v63  ;;  %v3544_v29 = vld [vmem:[#allocation3 + $0x18c] sm:$0xf]  ;;  %v2531_v38 = vld [vmem:[#allocation3 + $0x78] sm:$0xf0] }
  0xd3   :  { %1251 = vmatpush.bf16.msrb.mxu2 %v2818_v5  ;;  %1173 = vmatmul.bf16.vlgmr.msra.gmra.mxu0 %v4009_v9  ;;  %v3588_v5 = vld [vmem:[#allocation3 + $0x2ec] sm:$0xf]  ;;  %v2659_v41 = vld [vmem:[#allocation3 + $0x178] sm:$0xf0] }
  0xd4   :  { %1265 = vmatpush.bf16.msrb.mxu3 %v2946_v6  ;;  %1187 = vmatmul.bf16.vlgmr.msra.gmra.mxu1 %v4011_v15  ;;  %v2851_v6 = vld [vmem:[#allocation3 + $0x2f8] sm:$0xf0]  ;;  %v3508_v37 = vld [vmem:[#allocation3 + $0x6c] sm:$0xf] }
  0xd5   :  { %1225 = vmatpush.bf16.msrb.mxu0 %v2530_v8  ;;  %1239 = vmatpush.bf16.msrb.mxu1 %v2658_v56  ;;  %v3620_v8 = vld [vmem:[#allocation3 + $0x3ec] sm:$0xf]  ;;  %v2979_v56 = vld [vmem:[#allocation3 + $0x3f8] sm:$0xf0]  ;;  %v2534_v47 = vor.u32 %v3508_v37, %v2531_v38 }
  0xd6   :  { %v3540_v39 = vld [vmem:[#allocation3 + $0x16c] sm:$0xf]  ;;  %v2803_v45 = vld [vmem:[#allocation3 + $0x298] sm:$0xf0] }
  0xd7   :  { %1252 = vmatpush.bf16.msrb.mxu2 %v2802_v19  ;;  %v2854_v19 = vor.u32 %v3588_v5, %v2851_v6  ;;  %v3576_v44 = vld [vmem:[#allocation3 + $0x28c] sm:$0xf]  ;;  %v2931_v50 = vld [vmem:[#allocation3 + $0x398] sm:$0xf0] }
  0xd8   :  { %1266 = vmatpush.bf16.msrb.mxu3 %v2930_v20  ;;  %v2982_v20 = vor.u32 %v3620_v8, %v2979_v56  ;;  %v3608_v49 = vld [vmem:[#allocation3 + $0x38c] sm:$0xf]  ;;  %v2643_v54 = vld [vmem:[#allocation3 + $0x158] sm:$0xf0] }
  0xd9   :  { %1226 = vmatpush.bf16.msrb.mxu0 %v2514_v23  ;;  %1240 = vmatpush.bf16.msrb.mxu1 %v2642_v24  ;;  %v2566_v23 = vor.u32 %v3516_v10, %v2563_v12  ;;  %v2694_v24 = vor.u32 %v3548_v14, %v2691_v16  ;;  %v3536_v53 = vld [vmem:[#allocation3 + $0x14c] sm:$0xf]  ;;  %v2499_v2 = vld [vmem:[#allocation3 + $0x38] sm:$0xf0] }
  0xda   :  { %1201 = vmatmul.bf16.vlgmr.msra.gmra.mxu2 %v4017_v40  ;;  %v3572_v59 = vld [vmem:[#allocation3 + $0x26c] sm:$0xf]  ;;  %v2646_v62 = vor.u32 %v3536_v53, %v2643_v54  ;;  %v2627_v4 = vld [vmem:[#allocation3 + $0x138] sm:$0xf0]  ;;  %v3641_v53 = vld [vmem:[#allocation6 + $0x8c] sm:$0xf0] }
  0xdb   :  { %1215 = vmatmul.bf16.vlgmr.msra.gmra.mxu3 %v4019_v46  ;;  %1253 = vmatpush.bf16.msrb.mxu2 %v2786_v13  ;;  %v2838_v13 = vor.u32 %v3584_v21, %v2835_v22  ;;  %v3604_v63 = vld [vmem:[#allocation3 + $0x36c] sm:$0xf]  ;;  %v2483_v14 = vld [vmem:[#allocation3 + $0x18] sm:$0xf0]  ;;  %v3653_v21 = vld [vmem:[#allocation6 + $0xec] sm:$0xf0] }
  0xdc   :  { %1267 = vmatpush.bf16.msrb.mxu3 %v2914_v31  ;;  %v2966_v31 = vor.u32 %v3616_v25, %v2963_v26  ;;  %v3500_v1 = vld [vmem:[#allocation3 + $0x2c] sm:$0xf]  ;;  %v3225_v22 = vld [vmem:[#allocation6 + $0x1e0] sm:$0xf]  ;;  %v2755_v26 = vld [vmem:[#allocation3 + $0x238] sm:$0xf0] }
  0xdd   :  { %1227 = vmatpush.bf16.msrb.mxu0 %v2498_v35  ;;  %1241 = vmatpush.bf16.msrb.mxu1 %v2626_v18  ;;  %v2678_v35 = vor.u32 %v3544_v29, %v2675_v30  ;;  %v3612_v18 = vld [vmem:[#allocation3 + $0x3ac] sm:$0xf]  ;;  %v2502_v56 = vor.u32 %v3500_v1, %v2499_v2  ;;  %v2883_v30 = vld [vmem:[#allocation3 + $0x338] sm:$0xf0]  ;;  %v3001_v1 = vld [vmem:[#allocation6 + $0x20] sm:$0xf] }
  0xde   :  { %v3532_v3 = vld [vmem:[#allocation3 + $0x12c] sm:$0xf]  ;;  %v2739_v38 = vld [vmem:[#allocation3 + $0x218] sm:$0xf0]  ;;  %v3629_v2 = vld [vmem:[#allocation6 + $0x2c] sm:$0xf0] }
  0xdf   :  { %1254 = vmatpush.bf16.msrb.mxu2 %v2770_v43  ;;  %v2950_v43 = vor.u32 %v3612_v18, %v2947_v36  ;;  %v3600_v8 = vld [vmem:[#allocation3 + $0x34c] sm:$0xf]  ;;  %v2630_v10 = vor.u32 %v3532_v3, %v2627_v4  ;;  %v3681_v18 = vld [vmem:[#allocation6 + $0x1cc] sm:$0xf0]  ;;  %v3002_v3 = vor.u32 %v3629_v2, %v3001_v1  ;;  %v3195_v1 = vld [vmem:[#allocation6 + $0x1b0] sm:$0xf0] }
  0xe0   :  { %1268 = vmatpush.bf16.msrb.mxu3 %v2898_v48  ;;  %v2662_v48 = vor.u32 %v3540_v39, %v2659_v41  ;;  %v3496_v12 = vld [vmem:[#allocation3 + $0xc] sm:$0xf]  ;;  %v2867_v41 = vld [vmem:[#allocation3 + $0x318] sm:$0xf0]  ;;  %v3625_v4 = vld [vmem:[#allocation6 + $0xc] sm:$0xf0] }
  0xe1   :  { %1228 = vmatpush.bf16.msrb.mxu0 %v2482_v51  ;;  %1242 = vmatpush.bf16.msrb.mxu1 %v2610_v52  ;;  %v3504_v51 = vld [vmem:[#allocation3 + $0x4c] sm:$0xf]  ;;  %v2515_v52 = vld [vmem:[#allocation3 + $0x58] sm:$0xf0]  ;;  %v2486_v27 = vor.u32 %v3496_v12, %v2483_v14  ;;  %v3647_v12 = vld [vmem:[#allocation6 + $0xc4] sm:$0xf] }
  0xe2   :  { %v2518_v61 = vor.u32 %v3504_v51, %v2515_v52  ;;  %v3528_v16 = vld [vmem:[#allocation3 + $0x10c] sm:$0xf]  ;;  %v3049_v52 = vld [vmem:[#allocation6 + $0x80] sm:$0xf]  ;;  %v3083_v14 = vld [vmem:[#allocation6 + $0xd0] sm:$0xf0] }
  0xe3   :  { %1255 = vmatpush.bf16.msrb.mxu2 %v2754_v60  ;;  %v2787_v60 = vld [vmem:[#allocation3 + $0x278] sm:$0xf0]  ;;  %v3564_v25 = vld [vmem:[#allocation3 + $0x22c] sm:$0xf] }
  0xe4   :  { %1269 = vmatpush.bf16.msrb.mxu3 %v2882_v0  ;;  %1229 = vmatmul.bf16.vlgmr.msrb.gmra.mxu0 %v4009_v9  ;;  %v2915_v0 = vld [vmem:[#allocation3 + $0x378] sm:$0xf0]  ;;  %v2790_v5 = vor.u32 %v3572_v59, %v2787_v60  ;;  %v3596_v29 = vld [vmem:[#allocation3 + $0x32c] sm:$0xf]  ;;  %v2758_v33 = vor.u32 %v3564_v25, %v2755_v26  ;;  %v3050_v59 = vor.u32 %v3641_v53, %v3049_v52  ;;  %v3637_v60 = vld [vmem:[#allocation6 + $0x6c] sm:$0xf0] }
  0xe5   :  { %1277 = vmatpush.bf16.msra.mxu0 %v2598_v57  ;;  %1291 = vmatpush.bf16.msra.mxu1 %v2726_v58  ;;  %v2806_v57 = vor.u32 %v3576_v44, %v2803_v45  ;;  %v2934_v58 = vor.u32 %v3608_v49, %v2931_v50  ;;  %v2918_v6 = vor.u32 %v3604_v63, %v2915_v0  ;;  %v3560_v37 = vld [vmem:[#allocation3 + $0x20c] sm:$0xf]  ;;  %v3065_v45 = vld [vmem:[#allocation6 + $0xa0] sm:$0xf]  ;;  %v3677_v50 = vld [vmem:[#allocation6 + $0x1ac] sm:$0xf0] }
  0xe6   :  { %1243 = vmatmul.bf16.vlgmr.msrb.gmra.mxu1 %v4011_v15  ;;  %v2886_v36 = vor.u32 %v3596_v29, %v2883_v30  ;;  %v3592_v39 = vld [vmem:[#allocation3 + $0x30c] sm:$0xf]  ;;  %v2742_v44 = vor.u32 %v3560_v37, %v2739_v38  ;;  %v3193_v49 = vld [vmem:[#allocation6 + $0x1a0] sm:$0xf]  ;;  %v3633_v63 = vld [vmem:[#allocation6 + $0x4c] sm:$0xf0] }
  0xe7   :  { %1256 = vmatpush.bf16.msrb.mxu2 %v2738_v11  ;;  %v2899_v11 = vld [vmem:[#allocation3 + $0x358] sm:$0xf0]  ;;  %v3194_v54 = vor.u32 %v3677_v50, %v3193_v49  ;;  %v3643_v25 = vld [vmem:[#allocation6 + $0xa4] sm:$0xf]  ;;  %v3067_v26 = vld [vmem:[#allocation6 + $0xb0] sm:$0xf0] }
  0xe8   :  { %1270 = vmatpush.bf16.msrb.mxu3 %v2866_v17  ;;  %v2611_v17 = vld [vmem:[#allocation3 + $0x118] sm:$0xf0]  ;;  %v3661_v29 = vld [vmem:[#allocation6 + $0x12c] sm:$0xf0]  ;;  %v3321_v30 = vld [vmem:[#allocation6 + $0x2a0] sm:$0xf] }
  0xe9   :  { %1278 = vmatpush.bf16.msra.mxu0 %v2582_v7  ;;  %1292 = vmatpush.bf16.msra.mxu1 %v2710_v55  ;;  %v3568_v7 = vld [vmem:[#allocation3 + $0x24c] sm:$0xf]  ;;  %v2771_v55 = vld [vmem:[#allocation3 + $0x258] sm:$0xf0]  ;;  %v2614_v28 = vor.u32 %v3528_v16, %v2611_v17  ;;  %v3086_v17 = vor.u32 %v3647_v12, %v3083_v14  ;;  %v3305_v37 = vld [vmem:[#allocation6 + $0x280] sm:$0xf] }
  0xea   :  { %1257 = vmatmul.bf16.vlgmr.msrb.gmra.mxu2 %v4017_v40  ;;  %v3289_v49 = vld [vmem:[#allocation6 + $0x260] sm:$0xf]  ;;  %v3701_v50 = vld [vmem:[#allocation6 + $0x26c] sm:$0xf0]  ;;  %v3631_v52 = vld [vmem:[#allocation6 + $0x44] sm:$0xf] }
  0xeb   :  { %1305 = vmatpush.bf16.msra.mxu2 %v2854_v19  ;;  %1271 = vmatmul.bf16.vlgmr.msrb.gmra.mxu3 %v4019_v46  ;;  %v3097_v19 = vld [vmem:[#allocation6 + $0xe0] sm:$0xf]  ;;  %v3019_v53 = vld [vmem:[#allocation6 + $0x50] sm:$0xf0] }
  0xec   :  { %1319 = vmatpush.bf16.msra.mxu3 %v2982_v20  ;;  %v2774_v20 = vor.u32 %v3568_v7, %v2771_v55  ;;  %v3161_v55 = vld [vmem:[#allocation6 + $0x160] sm:$0xf] }
  0xed   :  { %1279 = vmatpush.bf16.msra.mxu0 %v2566_v23  ;;  %1293 = vmatpush.bf16.msra.mxu1 %v2694_v24  ;;  %v3685_v23 = vld [vmem:[#allocation6 + $0x1ec] sm:$0xf0]  ;;  %v2902_v24 = vor.u32 %v3600_v8, %v2899_v11 }
  0xee   :  { %v3226_v32 = vor.u32 %v3685_v23, %v3225_v22  ;;  %v3669_v8 = vld [vmem:[#allocation6 + $0x16c] sm:$0xf0] }
  0xef   :  { %1306 = vmatpush.bf16.msra.mxu2 %v2838_v13  ;;  %v3098_v13 = vor.u32 %v3653_v21, %v3097_v19  ;;  %v3717_v11 = vld [vmem:[#allocation6 + $0x2ec] sm:$0xf0]  ;;  %v3145_v19 = vld [vmem:[#allocation6 + $0x140] sm:$0xf] }
  0xf0   :  { %1320 = vmatpush.bf16.msra.mxu3 %v2966_v31  ;;  %v3081_v31 = vld [vmem:[#allocation6 + $0xc0] sm:$0xf]  ;;  %v3713_v23 = vld [vmem:[#allocation6 + $0x2cc] sm:$0xf0] }
  0xf1   :  { %1280 = vmatpush.bf16.msra.mxu0 %v2550_v34  ;;  %1294 = vmatpush.bf16.msra.mxu1 %v2678_v35  ;;  %v3649_v34 = vld [vmem:[#allocation6 + $0xcc] sm:$0xf0]  ;;  %v3209_v35 = vld [vmem:[#allocation6 + $0x1c0] sm:$0xf] }
  0xf2   :  { %v3337_v21 = vld [vmem:[#allocation6 + $0x2c0] sm:$0xf] }
  0xf3   :  { %1307 = vmatpush.bf16.msra.mxu2 %v2822_v42  ;;  %v3082_v42 = vor.u32 %v3649_v34, %v3081_v31  ;;  %v3709_v31 = vld [vmem:[#allocation6 + $0x2ac] sm:$0xf0] }
  0xf4   :  { %1321 = vmatpush.bf16.msra.mxu3 %v2950_v43  ;;  %v3210_v43 = vor.u32 %v3681_v18, %v3209_v35  ;;  %v3322_v34 = vor.u32 %v3709_v31, %v3321_v30  ;;  %v3113_v18 = vld [vmem:[#allocation6 + $0x100] sm:$0xf]  ;;  %v3663_v30 = vld [vmem:[#allocation6 + $0x144] sm:$0xf] }
  0xf5   :  { %1281 = vmatpush.bf16.msra.mxu0 %v2534_v47  ;;  %1295 = vmatpush.bf16.msra.mxu1 %v2662_v48  ;;  %v3645_v47 = vld [vmem:[#allocation6 + $0xac] sm:$0xf0]  ;;  %v2870_v48 = vor.u32 %v3592_v39, %v2867_v41  ;;  %v3635_v41 = vld [vmem:[#allocation6 + $0x64] sm:$0xf] }
  0xf6   :  { %v3066_v51 = vor.u32 %v3645_v47, %v3065_v45  ;;  %v3705_v39 = vld [vmem:[#allocation6 + $0x28c] sm:$0xf0]  ;;  %v3683_v45 = vld [vmem:[#allocation6 + $0x1e4] sm:$0xf]  ;;  %v3227_v47 = vld [vmem:[#allocation6 + $0x1f0] sm:$0xf0] }
  0xf7   :  { %1308 = vmatpush.bf16.msra.mxu2 %v2806_v57  ;;  %v3177_v57 = vld [vmem:[#allocation6 + $0x180] sm:$0xf]  ;;  %v3711_v31 = vld [vmem:[#allocation6 + $0x2c4] sm:$0xf] }
  0xf8   :  { %1322 = vmatpush.bf16.msra.mxu3 %v2934_v58  ;;  %v3673_v58 = vld [vmem:[#allocation6 + $0x18c] sm:$0xf0] }
  0xf9   :  { %1282 = vmatpush.bf16.msra.mxu0 %v2518_v61  ;;  %1296 = vmatpush.bf16.msra.mxu1 %v2646_v62  ;;  %v3017_v62 = vld [vmem:[#allocation6 + $0x40] sm:$0xf] }
  0xfa   :  { %v3018_v0 = vor.u32 %v3633_v63, %v3017_v62  ;;  %v3003_v62 = vld [vmem:[#allocation6 + $0x30] sm:$0xf0]  ;;  %v3675_v63 = vld [vmem:[#allocation6 + $0x1a4] sm:$0xf] }
  0xfb   :  { %1309 = vmatpush.bf16.msra.mxu2 %v2790_v5  ;;  %v3198_v2 = vor.u32 %v3675_v63, %v3195_v1 }
  0xfc   :  { %1323 = vmatpush.bf16.msra.mxu3 %v2918_v6  ;;  %v3099_v6 = vld [vmem:[#allocation6 + $0xf0] sm:$0xf0] }
  0xfd   :  { %1283 = vmatpush.bf16.msra.mxu0 %v2502_v56  ;;  %1297 = vmatpush.bf16.msra.mxu1 %v2630_v10  ;;  %v3353_v56 = vld [vmem:[#allocation6 + $0x2e0] sm:$0xf]  ;;  %v3162_v10 = vor.u32 %v3669_v8, %v3161_v55  ;;  %v3179_v55 = vld [vmem:[#allocation6 + $0x190] sm:$0xf0] }
  0xfe   :  { %v3354_v16 = vor.u32 %v3717_v11, %v3353_v56  ;;  %v3241_v56 = vld [vmem:[#allocation6 + $0x200] sm:$0xf] }
  0xff   :  { %1310 = vmatpush.bf16.msra.mxu2 %v2774_v20  ;;  %v3665_v20 = vld [vmem:[#allocation6 + $0x14c] sm:$0xf0]  ;;  %v3481_v11 = vld [vmem:[#allocation6 + $0x3e0] sm:$0xf] }
 0x100   :  { %1324 = vmatpush.bf16.msra.mxu3 %v2902_v24  ;;  %v3146_v22 = vor.u32 %v3665_v20, %v3145_v19  ;;  %v3338_v24 = vor.u32 %v3713_v23, %v3337_v21  ;;  %v3163_v19 = vld [vmem:[#allocation6 + $0x170] sm:$0xf0] }
 0x101   :  { %1284 = vmatpush.bf16.msra.mxu0 %v2486_v27  ;;  %1298 = vmatpush.bf16.msra.mxu1 %v2614_v28  ;;  %v3070_v27 = vor.u32 %v3643_v25, %v3067_v26  ;;  %v3129_v28 = vld [vmem:[#allocation6 + $0x120] sm:$0xf]  ;;  %v3355_v23 = vld [vmem:[#allocation6 + $0x2f0] sm:$0xf0] }
 0x102   :  { %v4038_v26 = vld [vmem:[%s4090_s7] sm:$0xf] }
 0x103   :  { %1311 = vmatpush.bf16.msra.mxu2 %v2758_v33  ;;  %v3051_v33 = vld [vmem:[#allocation6 + $0x90] sm:$0xf0] }
 0x104   :  { %1325 = vmatpush.bf16.msra.mxu3 %v2886_v36  ;;  %1285 = vmatmul.bf16.vlgmr.msra.gmra.mxu0 %v4009_v9  ;;  %v3033_v9 = vld [vmem:[#allocation6 + $0x60] sm:$0xf]  ;;  %v3657_v36 = vld [vmem:[#allocation6 + $0x10c] sm:$0xf0] }
 0x105   :  { %2123 = vmatpush.bf16.msrb.mxu0 %v3098_v13  ;;  %2137 = vmatpush.bf16.msrb.mxu1 %v3226_v32  ;;  %v3034_v61 = vor.u32 %v3637_v60, %v3033_v9  ;;  %v3130_v13 = vor.u32 %v3661_v29, %v3129_v28  ;;  %v3639_v32 = vld [vmem:[#allocation6 + $0x84] sm:$0xf]  ;;  %v3114_v38 = vor.u32 %v3657_v36, %v3113_v18  ;;  %v3273_v9 = vld [vmem:[#allocation6 + $0x240] sm:$0xf]  ;;  %v3697_v60 = vld [vmem:[#allocation6 + $0x24c] sm:$0xf0] }
 0x106   :  { %1299 = vmatmul.bf16.vlgmr.msra.gmra.mxu1 %v4011_v15  ;;  %v3178_v15 = vor.u32 %v3673_v58, %v3177_v57  ;;  %v3054_v35 = vor.u32 %v3639_v32, %v3051_v33  ;;  %v3022_v57 = vor.u32 %v3631_v52, %v3019_v53  ;;  %v3211_v58 = vld [vmem:[#allocation6 + $0x1d0] sm:$0xf0]  ;;  %v3745_v28 = vld [vmem:[#allocation6 + $0x3cc] sm:$0xf0]  ;;  %v3449_v18 = vld [vmem:[#allocation6 + $0x3a0] sm:$0xf] }
 0x107   :  { %1312 = vmatpush.bf16.msra.mxu2 %v2742_v44  ;;  %v3339_v33 = vld [vmem:[#allocation6 + $0x2d0] sm:$0xf0]  ;;  %v3741_v36 = vld [vmem:[#allocation6 + $0x3ac] sm:$0xf0]  ;;  %v3655_v52 = vld [vmem:[#allocation6 + $0x104] sm:$0xf] }
 0x108   :  { %1326 = vmatpush.bf16.msra.mxu3 %v2870_v48  ;;  %v3230_v48 = vor.u32 %v3683_v45, %v3227_v47  ;;  %v3433_v47 = vld [vmem:[#allocation6 + $0x380] sm:$0xf]  ;;  %v3115_v53 = vld [vmem:[#allocation6 + $0x110] sm:$0xf0] }
 0x109   :  { %2124 = vmatpush.bf16.msrb.mxu0 %v3082_v42  ;;  %2138 = vmatpush.bf16.msrb.mxu1 %v3210_v43  ;;  %v3035_v42 = vld [vmem:[#allocation6 + $0x70] sm:$0xf0]  ;;  %v3306_v43 = vor.u32 %v3705_v39, %v3305_v37  ;;  %v3659_v39 = vld [vmem:[#allocation6 + $0x124] sm:$0xf] }
 0x10a   :  { %1313 = vmatmul.bf16.vlgmr.msra.gmra.mxu2 %v4017_v40  ;;  %v2985_v40 = vld [vmem:[#allocation6] sm:$0xf]  ;;  %v3038_v44 = vor.u32 %v3635_v41, %v3035_v42  ;;  %v3131_v41 = vld [vmem:[#allocation6 + $0x130] sm:$0xf0]  ;;  %v3707_v42 = vld [vmem:[#allocation6 + $0x2a4] sm:$0xf] }
 0x10b   :  { %1327 = vmatmul.bf16.vlgmr.msra.gmra.mxu3 %v4019_v46  ;;  %v2986_v5 = vor.u32 %v3625_v4, %v2985_v40  ;;  %v3651_v46 = vld [vmem:[#allocation6 + $0xe4] sm:$0xf]  ;;  %2151 = vmatpush.bf16.msrb.mxu2 %v3354_v16  ;;  %v3693_v40 = vld [vmem:[#allocation6 + $0x22c] sm:$0xf0] }
 0x10c   :  { %v3102_v7 = vor.u32 %v3651_v46, %v3099_v6  ;;  %v2987_v46 = vld [vmem:[#allocation6 + $0x10] sm:$0xf0]  ;;  %v3671_v6 = vld [vmem:[#allocation6 + $0x184] sm:$0xf]  ;;  %v3749_v16 = vld [vmem:[#allocation6 + $0x3ec] sm:$0xf0] }
 0x10d   :  { %2125 = vmatpush.bf16.msrb.mxu0 %v3066_v51  ;;  %2139 = vmatpush.bf16.msrb.mxu1 %v3194_v54  ;;  %v3290_v51 = vor.u32 %v3701_v50, %v3289_v49  ;;  %v3679_v54 = vld [vmem:[#allocation6 + $0x1c4] sm:$0xf]  ;;  %v3182_v8 = vor.u32 %v3671_v6, %v3179_v55  ;;  %v3482_v20 = vor.u32 %v3749_v16, %v3481_v11 }
 0x10e   :  { %v3695_v55 = vld [vmem:[#allocation6 + $0x244] sm:$0xf] }
 0x10f   :  { %2152 = vmatpush.bf16.msrb.mxu2 %v3338_v24  ;;  %2165 = vmatpush.bf16.msrb.mxu3 %v3482_v20  ;;  %v3385_v20 = vld [vmem:[#allocation6 + $0x320] sm:$0xf] }
 0x111   :  { %2126 = vmatpush.bf16.msrb.mxu0 %v3050_v59  ;;  %2140 = vmatpush.bf16.msrb.mxu1 %v3178_v15  ;;  %v3214_v59 = vor.u32 %v3679_v54, %v3211_v58  ;;  %v3274_v15 = vor.u32 %v3697_v60, %v3273_v9  ;;  %v3703_v54 = vld [vmem:[#allocation6 + $0x284] sm:$0xf]  ;;  %v3118_v58 = vor.u32 %v3655_v52, %v3115_v53  ;;  %v3646_v53 = vld [vmem:[#allocation6 + $0xb4] sm:$0xf0] }
 0x113   :  { %2153 = vmatpush.bf16.msrb.mxu2 %v3322_v34  ;;  %v3342_v34 = vor.u32 %v3711_v31, %v3339_v33  ;;  %v3089_v31 = vld [vmem:[#allocation6 + $0xc8] sm:$0xf]  ;;  %v3650_v33 = vld [vmem:[#allocation6 + $0xd4] sm:$0xf0] }
 0x115   :  { %2127 = vmatpush.bf16.msrb.mxu0 %v3034_v61  ;;  %2141 = vmatpush.bf16.msrb.mxu1 %v3162_v10  ;;  %v3627_v61 = vld [vmem:[#allocation6 + $0x24] sm:$0xf]  ;;  %v3689_v10 = vld [vmem:[#allocation6 + $0x20c] sm:$0xf0] }
 0x116   :  { %v3242_v14 = vor.u32 %v3689_v10, %v3241_v56 }
 0x117   :  { %2154 = vmatpush.bf16.msrb.mxu2 %v3306_v43  ;;  %v3134_v43 = vor.u32 %v3659_v39, %v3131_v41  ;;  %v3243_v39 = vld [vmem:[#allocation6 + $0x210] sm:$0xf0]  ;;  %v3747_v41 = vld [vmem:[#allocation6 + $0x3e4] sm:$0xf] }
 0x119   :  { %2128 = vmatpush.bf16.msrb.mxu0 %v3018_v0  ;;  %2142 = vmatpush.bf16.msrb.mxu1 %v3146_v22  ;;  %v3006_v0 = vor.u32 %v3627_v61, %v3003_v62  ;;  %v3715_v22 = vld [vmem:[#allocation6 + $0x2e4] sm:$0xf]  ;;  %v3733_v61 = vld [vmem:[#allocation6 + $0x36c] sm:$0xf0] }
 0x11a   :  { %v3358_v25 = vor.u32 %v3715_v22, %v3355_v23  ;;  %v3654_v23 = vld [vmem:[#allocation6 + $0xf4] sm:$0xf0] }
 0x11b   :  { %2155 = vmatpush.bf16.msrb.mxu2 %v3290_v51 }
 0x11d   :  { %2129 = vmatpush.bf16.msrb.mxu0 %v3002_v3  ;;  %2143 = vmatpush.bf16.msrb.mxu1 %v3130_v13  ;;  %v3257_v3 = vld [vmem:[#allocation6 + $0x220] sm:$0xf]  ;;  %v3147_v13 = vld [vmem:[#allocation6 + $0x150] sm:$0xf0] }
 0x11e   :  { %v3258_v4 = vor.u32 %v3693_v40, %v3257_v3  ;;  %v3150_v32 = vor.u32 %v3663_v30, %v3147_v13  ;;  %v3291_v3 = vld [vmem:[#allocation6 + $0x270] sm:$0xf0] }
 0x11f   :  { %2156 = vmatpush.bf16.msrb.mxu2 %v3274_v15  ;;  %v3417_v15 = vld [vmem:[#allocation6 + $0x360] sm:$0xf] }
 0x120   :  { %v3418_v1 = vor.u32 %v3733_v61, %v3417_v15  ;;  %v3057_v15 = vld [vmem:[#allocation6 + $0x88] sm:$0xf] }
 0x121   :  { %2130 = vmatpush.bf16.msrb.mxu0 %v2986_v5  ;;  %2144 = vmatpush.bf16.msrb.mxu1 %v3114_v38  ;;  %v3623_v5 = vld [vmem:[#allocation6 + $0x4] sm:$0xf]  ;;  %v3450_v38 = vor.u32 %v3741_v36, %v3449_v18 }
 0x123   :  { %2157 = vmatpush.bf16.msrb.mxu2 %v3258_v4 }
 0x125   :  { %2179 = vmatpush.bf16.msra.mxu0 %v3102_v7  ;;  %2193 = vmatpush.bf16.msra.mxu1 %v3230_v48  ;;  %v2990_v7 = vor.u32 %v3623_v5, %v2987_v46  ;;  %v3737_v48 = vld [vmem:[#allocation6 + $0x38c] sm:$0xf0]  ;;  %v3401_v5 = vld [vmem:[#allocation6 + $0x340] sm:$0xf] }
 0x126   :  { %v3434_v51 = vor.u32 %v3737_v48, %v3433_v47  ;;  %v3729_v46 = vld [vmem:[#allocation6 + $0x34c] sm:$0xf0]  ;;  %v3090_v48 = vor.u32 %v3650_v33, %v3089_v31 }
 0x127   :  { %2158 = vmatpush.bf16.msrb.mxu2 %v3242_v14 }
 0x129   :  { %2180 = vmatpush.bf16.msra.mxu0 %v3086_v17  ;;  %2194 = vmatpush.bf16.msra.mxu1 %v3214_v59  ;;  %v3667_v17 = vld [vmem:[#allocation6 + $0x164] sm:$0xf]  ;;  %v3307_v59 = vld [vmem:[#allocation6 + $0x290] sm:$0xf0] }
 0x12a   :  { %v3166_v21 = vor.u32 %v3667_v17, %v3163_v19  ;;  %v3310_v60 = vor.u32 %v3703_v54, %v3307_v59  ;;  %v3105_v19 = vld [vmem:[#allocation6 + $0xe8] sm:$0xf]  ;;  %v3743_v54 = vld [vmem:[#allocation6 + $0x3c4] sm:$0xf] }
 0x12b   :  { %2207 = vmatpush.bf16.msra.mxu2 %v3358_v25  ;;  %v3691_v25 = vld [vmem:[#allocation6 + $0x224] sm:$0xf] }
 0x12d   :  { %2181 = vmatpush.bf16.msra.mxu0 %v3070_v27  ;;  %2195 = vmatpush.bf16.msra.mxu1 %v3198_v2  ;;  %v3465_v27 = vld [vmem:[#allocation6 + $0x3c0] sm:$0xf]  ;;  %v3699_v2 = vld [vmem:[#allocation6 + $0x264] sm:$0xf] }
 0x12e   :  { %v3466_v29 = vor.u32 %v3745_v28, %v3465_v27  ;;  %v3294_v40 = vor.u32 %v3699_v2, %v3291_v3  ;;  %v3259_v27 = vld [vmem:[#allocation6 + $0x230] sm:$0xf0] }
 0x12f   :  { %2208 = vmatpush.bf16.msra.mxu2 %v3342_v34  ;;  %v3369_v34 = vld [vmem:[#allocation6 + $0x300] sm:$0xf] }
 0x130   :  { %2166 = vmatpush.bf16.msrb.mxu3 %v3466_v29  ;;  %v3262_v29 = vor.u32 %v3691_v25, %v3259_v27  ;;  %v3682_v25 = vld [vmem:[#allocation6 + $0x1d4] sm:$0xf0]  ;;  %v3731_v27 = vld [vmem:[#allocation6 + $0x364] sm:$0xf] }
 0x131   :  { %2182 = vmatpush.bf16.msra.mxu0 %v3054_v35  ;;  %2196 = vmatpush.bf16.msra.mxu1 %v3182_v8  ;;  %v461_v35 = vperm.slane %v4038_v26, 0  ;;  %v3275_v8 = vld [vmem:[#allocation6 + $0x250] sm:$0xf0] }
 0x132   :  { %v3278_v10 = vor.u32 %v3695_v55, %v3275_v8  ;;  %v3686_v8 = vld [vmem:[#allocation6 + $0x1f4] sm:$0xf0] }
 0x134   :  { %2167 = vmatpush.bf16.msrb.mxu3 %v3450_v38  ;;  %v3687_v38 = vld [vmem:[#allocation6 + $0x204] sm:$0xf] }
 0x135   :  { %2183 = vmatpush.bf16.msra.mxu0 %v3038_v44  ;;  %2197 = vmatpush.bf16.msra.mxu1 %v3166_v21  ;;  %v3323_v44 = vld [vmem:[#allocation6 + $0x2b0] sm:$0xf0]  ;;  %v3725_v21 = vld [vmem:[#allocation6 + $0x32c] sm:$0xf0] }
 0x136   :  { %v3326_v45 = vor.u32 %v3707_v42, %v3323_v44  ;;  %v3483_v44 = vld [vmem:[#allocation6 + $0x3f0] sm:$0xf0] }
 0x137   :  { %v3486_v47 = vor.u32 %v3747_v41, %v3483_v44  ;;  %v3403_v41 = vld [vmem:[#allocation6 + $0x350] sm:$0xf0] }
 0x138   :  { %2209 = vmatpush.bf16.msra.mxu2 %v3326_v45  ;;  %2168 = vmatpush.bf16.msrb.mxu3 %v3434_v51 }
 0x139   :  { %2184 = vmatpush.bf16.msra.mxu0 %v3022_v57  ;;  %2198 = vmatpush.bf16.msra.mxu1 %v3150_v32  ;;  %v3106_v32 = vor.u32 %v3654_v23, %v3105_v19  ;;  %v3217_v23 = vld [vmem:[#allocation6 + $0x1c8] sm:$0xf] }
 0x13c   :  { %2210 = vmatpush.bf16.msra.mxu2 %v3310_v60  ;;  %2169 = vmatpush.bf16.msrb.mxu3 %v3418_v1 }
 0x13d   :  { %2185 = vmatpush.bf16.msra.mxu0 %v3006_v0  ;;  %2199 = vmatpush.bf16.msra.mxu1 %v3134_v43  ;;  %v3246_v43 = vor.u32 %v3687_v38, %v3243_v39  ;;  %v3678_v38 = vld [vmem:[#allocation6 + $0x1b4] sm:$0xf0]  ;;  %v3727_v39 = vld [vmem:[#allocation6 + $0x344] sm:$0xf] }
 0x13e   :  { %v3406_v44 = vor.u32 %v3727_v39, %v3403_v41  ;;  %v3121_v41 = vld [vmem:[#allocation6 + $0x108] sm:$0xf] }
 0x140   :  { %v1118_v12 = vpop.f32.mrf.mxu0  ;;  %2211 = vmatpush.bf16.msra.mxu2 %v3294_v40 }
 0x141   :  { %2186 = vmatpush.bf16.msra.mxu0 %v2990_v7  ;;  %v1132_v24 = vpop.f32.mrf.mxu1  ;;  %v1119_v49 = vadd.f32 %v1118_v12, %v461_v35  ;;  %2200 = vmatpush.bf16.msra.mxu1 %v3118_v58  ;;  %v3402_v7 = vor.u32 %v3729_v46, %v3401_v5  ;;  %v462_v12 = vperm.slane %v4038_v26, 1  ;;  %v3041_v46 = vld [vmem:[#allocation6 + $0x68] sm:$0xf] }
 0x143   :  { %v1133_v62 = vadd.f32 %v1132_v24, %v1119_v49  ;;  %2170 = vmatpush.bf16.msrb.mxu3 %v3402_v7  ;;  %v3386_v24 = vor.u32 %v3725_v21, %v3385_v20  ;;  %v3073_v49 = vld [vmem:[#allocation6 + $0xa8] sm:$0xf] }
 0x144   :  { %2212 = vmatpush.bf16.msra.mxu2 %v3278_v10  ;;  %v3074_v60 = vor.u32 %v3646_v53, %v3073_v49  ;;  %v3233_v7 = vld [vmem:[#allocation6 + $0x1e8] sm:$0xf]  ;;  %v3435_v10 = vld [vmem:[#allocation6 + $0x390] sm:$0xf0]  ;;  %v3674_v53 = vld [vmem:[#allocation6 + $0x194] sm:$0xf0] }
 0x145   :  { %v3234_v20 = vor.u32 %v3686_v8, %v3233_v7  ;;  %v3025_v21 = vld [vmem:[#allocation6 + $0x48] sm:$0xf]  ;;  %v3718_v7 = vld [vmem:[#allocation6 + $0x2f4] sm:$0xf0]  ;;  %v3091_v8 = vld [vmem:[#allocation6 + $0xd8] sm:$0xf0] }
 0x146   :  { %v2993_v49 = vld [vmem:[#allocation6 + $0x8] sm:$0xf] }
 0x147   :  { %2171 = vmatpush.bf16.msrb.mxu3 %v3386_v24 }
 0x148   :  { %v1120_v37 = vpop.f32.mrf.mxu0  ;;  %2213 = vmatpush.bf16.msra.mxu2 %v3262_v29 }
 0x149   :  { %v1134_v50 = vpop.f32.mrf.mxu1  ;;  %v1121_v63 = vadd.f32 %v1120_v37, %v461_v35  ;;  %v3721_v35 = vld [vmem:[#allocation6 + $0x30c] sm:$0xf0] }
 0x14a   :  { %v3370_v37 = vor.u32 %v3721_v35, %v3369_v34  ;;  %v3218_v34 = vor.u32 %v3682_v25, %v3217_v23  ;;  %v3009_v35 = vld [vmem:[#allocation6 + $0x28] sm:$0xf]  ;;  %v3644_v23 = vld [vmem:[#allocation6 + $0xac] sm:$0xf]  ;;  %v3075_v25 = vld [vmem:[#allocation6 + $0xb8] sm:$0xf0] }
 0x14b   :  { %v1135_v6 = vadd.f32 %v1134_v50, %v1121_v63  ;;  %v3739_v63 = vld [vmem:[#allocation6 + $0x3a4] sm:$0xf] }
 0x14c   :  { %2172 = vmatpush.bf16.msrb.mxu3 %v3370_v37  ;;  %2214 = vmatpush.bf16.msra.mxu2 %v3246_v43  ;;  %v3201_v37 = vld [vmem:[#allocation6 + $0x1a8] sm:$0xf] }
 0x14d   :  { %v1146_v57 = vpop.f32.mrf.mxu2 }
 0x14e   :  { %v1160_v9 = vpop.f32.mrf.mxu3  ;;  %v1147_v4 = vadd.f32 %v1146_v57, %v1133_v62  ;;  %v3467_v57 = vld [vmem:[#allocation6 + $0x3d0] sm:$0xf0]  ;;  %v3642_v62 = vld [vmem:[#allocation6 + $0x94] sm:$0xf0] }
 0x14f   :  { %v3470_v58 = vor.u32 %v3743_v54, %v3467_v57  ;;  %v3058_v5 = vor.u32 %v3642_v62, %v3057_v15  ;;  %v3723_v54 = vld [vmem:[#allocation6 + $0x324] sm:$0xf]  ;;  %v3387_v57 = vld [vmem:[#allocation6 + $0x330] sm:$0xf0] }
 0x150   :  { %v1174_v0 = vpop.f32.mrf.mxu0  ;;  %v1161_v11 = vadd.f32 %v1160_v9, %v1147_v4  ;;  %2221 = vmatpush.bf16.msra.mxu3 %v3486_v47 }
 0x151   :  { %v1188_v14 = vpop.f32.mrf.mxu1  ;;  %v1175_v18 = vadd.f32 %v1174_v0, %v462_v12  ;;  %v3451_v0 = vld [vmem:[#allocation6 + $0x3b0] sm:$0xf0] }
 0x152   :  { %v1333_v30 = vmax.f32 %v1161_v11, 0.0  ;;  %v3454_v2 = vor.u32 %v3739_v63, %v3451_v0  ;;  %v463_v11 = vperm.slane %v4038_v26, 2 }
 0x153   :  { %v1189_v50 = vadd.f32 %v1188_v14, %v1175_v18  ;;  %v3630_v18 = vld [vmem:[#allocation6 + $0x34] sm:$0xf0] }
 0x154   :  { %2222 = vmatpush.bf16.msra.mxu3 %v3470_v58  ;;  %v3010_v47 = vor.u32 %v3630_v18, %v3009_v35  ;;  %v3059_v35 = vld [vmem:[#allocation6 + $0x98] sm:$0xf0]  ;;  %v464_v18 = vperm.slane %v4038_v26, 3 }
 0x155   :  { %v1148_v56 = vpop.f32.mrf.mxu2 }
 0x156   :  { %v1149_v16 = vadd.f32 %v1148_v56, %v1135_v6  ;;  %v1162_v17 = vpop.f32.mrf.mxu3  ;;  %v3638_v6 = vld [vmem:[#allocation6 + $0x74] sm:$0xf0]  ;;  %v3735_v56 = vld [vmem:[#allocation6 + $0x384] sm:$0xf] }
 0x157   :  { %v3042_v19 = vor.u32 %v3638_v6, %v3041_v46  ;;  %v3371_v46 = vld [vmem:[#allocation6 + $0x310] sm:$0xf0] }
 0x158   :  { %v1163_v22 = vadd.f32 %v1162_v17, %v1149_v16  ;;  %v1176_v28 = vpop.f32.mrf.mxu0  ;;  %2223 = vmatpush.bf16.msra.mxu3 %v3454_v2  ;;  %v3670_v2 = vld [vmem:[#allocation6 + $0x174] sm:$0xf0] }
 0x159   :  { %v1177_v51 = vadd.f32 %v1176_v28, %v462_v12  ;;  %v1190_v52 = vpop.f32.mrf.mxu1  ;;  %v3438_v12 = vor.u32 %v3735_v56, %v3435_v10  ;;  %v3419_v28 = vld [vmem:[#allocation6 + $0x370] sm:$0xf0] }
 0x15a   :  { %v1337_v13 = vmax.f32 %v1163_v22, 0.0  ;;  %v3634_v22 = vld [vmem:[#allocation6 + $0x54] sm:$0xf0] }
 0x15b   :  { %v1191_v61 = vadd.f32 %v1190_v52, %v1177_v51  ;;  %v3026_v33 = vor.u32 %v3634_v22, %v3025_v21  ;;  %v3185_v51 = vld [vmem:[#allocation6 + $0x188] sm:$0xf]  ;;  %v3714_v22 = vld [vmem:[#allocation6 + $0x2d4] sm:$0xf0] }
 0x15c   :  { %v4042_v36 = vpack.c.bf16 %v1337_v13, %v1333_v30  ;;  %2224 = vmatpush.bf16.msra.mxu3 %v3438_v12  ;;  %v3422_v13 = vor.u32 %v3731_v27, %v3419_v28  ;;  %v3186_v0 = vor.u32 %v3674_v53, %v3185_v51  ;;  %v3297_v53 = vld [vmem:[#allocation6 + $0x268] sm:$0xf] }
 0x15d   :  { %v1202_v42 = vpop.f32.mrf.mxu2 }
 0x15e   :  { %v1216_v45 = vpop.f32.mrf.mxu3  ;;  %2131 = vmatmul.bf16.vlgmr.msrb.gmra.mxu0 %v4042_v36  ;;  %v1203_v59 = vadd.f32 %v1202_v42, %v1189_v50  ;;  %v3626_v50 = vld [vmem:[#allocation6 + $0x14] sm:$0xf0] }
 0x15f   :  { %2235 = vmatpush.bf16.msrb.mxu0 %v3106_v32 }
 0x160   :  { %v1217_v3 = vadd.f32 %v1216_v45, %v1203_v59  ;;  %2225 = vmatpush.bf16.msra.mxu3 %v3422_v13  ;;  %v3652_v59 = vld [vmem:[#allocation6 + $0xec] sm:$0xf]  ;;  %v3137_v13 = vld [vmem:[#allocation6 + $0x128] sm:$0xf] }
 0x161   :  { %v1230_v9 = vpop.f32.mrf.mxu0 }
 0x162   :  { %v1334_v14 = vmax.f32 %v1217_v3, 0.0  ;;  %v1231_v29 = vadd.f32 %v1230_v9, %v463_v11  ;;  %v3107_v9 = vld [vmem:[#allocation6 + $0xf8] sm:$0xf0] }
 0x163   :  { %2236 = vmatpush.bf16.msrb.mxu0 %v3090_v48  ;;  %v1244_v16 = vpop.f32.mrf.mxu1  ;;  %v3202_v48 = vor.u32 %v3678_v38, %v3201_v37 }
 0x164   :  { %v1245_v42 = vadd.f32 %v1244_v16, %v1231_v29  ;;  %2226 = vmatpush.bf16.msra.mxu3 %v3406_v44  ;;  %v3706_v44 = vld [vmem:[#allocation6 + $0x294] sm:$0xf0] }
 0x165   :  { %v1204_v1 = vpop.f32.mrf.mxu2 }
 0x166   :  { %v1205_v40 = vadd.f32 %v1204_v1, %v1191_v61  ;;  %v1218_v4 = vpop.f32.mrf.mxu3  ;;  %v2994_v61 = vor.u32 %v3626_v50, %v2993_v49  ;;  %v3169_v1 = vld [vmem:[#allocation6 + $0x168] sm:$0xf]  ;;  %v3684_v49 = vld [vmem:[#allocation6 + $0x1ec] sm:$0xf]  ;;  %v3235_v50 = vld [vmem:[#allocation6 + $0x1f8] sm:$0xf0] }
 0x167   :  { %2237 = vmatpush.bf16.msrb.mxu0 %v3074_v60  ;;  %v3390_v60 = vor.u32 %v3723_v54, %v3387_v57  ;;  %v3170_v12 = vor.u32 %v3670_v2, %v3169_v1  ;;  %v3238_v57 = vor.u32 %v3684_v49, %v3235_v50  ;;  %v3281_v2 = vld [vmem:[#allocation6 + $0x248] sm:$0xf] }
 0x168   :  { %v1219_v55 = vadd.f32 %v1218_v4, %v1205_v40  ;;  %v3110_v40 = vor.u32 %v3652_v59, %v3107_v9  ;;  %v3361_v4 = vld [vmem:[#allocation6 + $0x2e8] sm:$0xf]  ;;  %v3632_v59 = vld [vmem:[#allocation6 + $0x4c] sm:$0xf]  ;;  %v3027_v9 = vld [vmem:[#allocation6 + $0x58] sm:$0xf0] }
 0x169   :  { %v1232_v30 = vpop.f32.mrf.mxu0  ;;  %2227 = vmatpush.bf16.msra.mxu3 %v3390_v60  ;;  %v3030_v1 = vor.u32 %v3632_v59, %v3027_v9  ;;  %v3473_v50 = vld [vmem:[#allocation6 + $0x3c8] sm:$0xf] }
 0x16a   :  { %v1338_v17 = vmax.f32 %v1219_v55, 0.0  ;;  %v1233_v43 = vadd.f32 %v1232_v30, %v463_v11  ;;  %v3648_v55 = vld [vmem:[#allocation6 + $0xcc] sm:$0xf]  ;;  %v3078_v30 = vor.u32 %v3644_v23, %v3075_v25  ;;  %v3187_v25 = vld [vmem:[#allocation6 + $0x198] sm:$0xf0] }
 0x16b   :  { %2238 = vmatpush.bf16.msrb.mxu0 %v3058_v5  ;;  %v1246_v52 = vpop.f32.mrf.mxu1  ;;  %v3719_v5 = vld [vmem:[#allocation6 + $0x304] sm:$0xf]  ;;  %v3094_v16 = vor.u32 %v3648_v55, %v3091_v8  ;;  %v3203_v55 = vld [vmem:[#allocation6 + $0x1b8] sm:$0xf0]  ;;  %v3672_v23 = vld [vmem:[#allocation6 + $0x18c] sm:$0xf] }
 0x16c   :  { %v4046_v24 = vpack.c.bf16 %v1338_v17, %v1334_v14  ;;  %v1247_v58 = vadd.f32 %v1246_v52, %v1233_v43  ;;  %v3374_v56 = vor.u32 %v3719_v5, %v3371_v46  ;;  %v3362_v14 = vor.u32 %v3718_v7, %v3361_v4  ;;  %v3153_v17 = vld [vmem:[#allocation6 + $0x148] sm:$0xf]  ;;  %v3698_v5 = vld [vmem:[#allocation6 + $0x254] sm:$0xf0]  ;;  %v3628_v46 = vld [vmem:[#allocation6 + $0x2c] sm:$0xf] }
 0x16d   :  { %v1258_v31 = vpop.f32.mrf.mxu2  ;;  %v3313_v43 = vld [vmem:[#allocation6 + $0x288] sm:$0xf]  ;;  %v3676_v7 = vld [vmem:[#allocation6 + $0x1ac] sm:$0xf] }
 0x16e   :  { %v1272_v32 = vpop.f32.mrf.mxu3  ;;  %2145 = vmatmul.bf16.vlgmr.msrb.gmra.mxu1 %v4046_v24  ;;  %2187 = vmatmul.bf16.vlgmr.msra.gmra.mxu0 %v4042_v36  ;;  %v1259_v45 = vadd.f32 %v1258_v31, %v1245_v42  ;;  %v3662_v31 = vld [vmem:[#allocation6 + $0x134] sm:$0xf0]  ;;  %v3314_v26 = vor.u32 %v3706_v44, %v3313_v43  ;;  %v3457_v9 = vld [vmem:[#allocation6 + $0x3a8] sm:$0xf] }
 0x16f   :  { %2239 = vmatpush.bf16.msrb.mxu0 %v3042_v19  ;;  %2249 = vmatpush.bf16.msrb.mxu1 %v3234_v20  ;;  %v3666_v19 = vld [vmem:[#allocation6 + $0x154] sm:$0xf0]  ;;  %v3345_v20 = vld [vmem:[#allocation6 + $0x2c8] sm:$0xf]  ;;  %v3138_v37 = vor.u32 %v3662_v31, %v3137_v13 }
 0x170   :  { %v1273_v62 = vadd.f32 %v1272_v32, %v1259_v45  ;;  %2228 = vmatpush.bf16.msra.mxu3 %v3374_v56  ;;  %v3154_v27 = vor.u32 %v3666_v19, %v3153_v17  ;;  %v3346_v29 = vor.u32 %v3714_v22, %v3345_v20  ;;  %v3329_v32 = vld [vmem:[#allocation6 + $0x2a8] sm:$0xf]  ;;  %v3658_v42 = vld [vmem:[#allocation6 + $0x114] sm:$0xf0]  ;;  %v3636_v45 = vld [vmem:[#allocation6 + $0x6c] sm:$0xf] }
 0x171   :  { %v3122_v51 = vor.u32 %v3658_v42, %v3121_v41  ;;  %v3694_v17 = vld [vmem:[#allocation6 + $0x234] sm:$0xf0]  ;;  %v3624_v19 = vld [vmem:[#allocation6 + $0xc] sm:$0xf]  ;;  %v2995_v20 = vld [vmem:[#allocation6 + $0x18] sm:$0xf0] }
 0x172   :  { %v1335_v10 = vmax.f32 %v1273_v62, 0.0  ;;  %v3219_v62 = vld [vmem:[#allocation6 + $0x1d8] sm:$0xf0]  ;;  %v2998_v13 = vor.u32 %v3624_v19, %v2995_v20  ;;  %v3249_v31 = vld [vmem:[#allocation6 + $0x208] sm:$0xf] }
 0x173   :  { %2240 = vmatpush.bf16.msrb.mxu0 %v3026_v33  ;;  %2250 = vmatpush.bf16.msrb.mxu1 %v3218_v34  ;;  %v3710_v33 = vld [vmem:[#allocation6 + $0x2b4] sm:$0xf0]  ;;  %v3640_v34 = vld [vmem:[#allocation6 + $0x8c] sm:$0xf]  ;;  %v3363_v41 = vld [vmem:[#allocation6 + $0x2f8] sm:$0xf0] }
 0x174   :  { %v3330_v38 = vor.u32 %v3710_v33, %v3329_v32  ;;  %v3062_v39 = vor.u32 %v3640_v34, %v3059_v35  ;;  %v3690_v32 = vld [vmem:[#allocation6 + $0x214] sm:$0xf0]  ;;  %v3190_v34 = vor.u32 %v3672_v23, %v3187_v25  ;;  %v3489_v35 = vld [vmem:[#allocation6 + $0x3e8] sm:$0xf]  ;;  %v3696_v19 = vld [vmem:[#allocation6 + $0x24c] sm:$0xf] }
 0x175   :  { %v1260_v15 = vpop.f32.mrf.mxu2  ;;  %v3250_v44 = vor.u32 %v3690_v32, %v3249_v31  ;;  %v3283_v20 = vld [vmem:[#allocation6 + $0x258] sm:$0xf0]  ;;  %v3393_v25 = vld [vmem:[#allocation6 + $0x328] sm:$0xf]  ;;  %v3722_v32 = vld [vmem:[#allocation6 + $0x314] sm:$0xf0] }
 0x176   :  { %v1261_v63 = vadd.f32 %v1260_v15, %v1247_v58  ;;  %v1274_v3 = vpop.f32.mrf.mxu3  ;;  %v3702_v58 = vld [vmem:[#allocation6 + $0x274] sm:$0xf0]  ;;  %v3286_v23 = vor.u32 %v3696_v19, %v3283_v20  ;;  %v3377_v31 = vld [vmem:[#allocation6 + $0x308] sm:$0xf] }
 0x177   :  { %2241 = vmatpush.bf16.msrb.mxu0 %v3010_v47  ;;  %2251 = vmatpush.bf16.msrb.mxu1 %v3202_v48  ;;  %v3043_v47 = vld [vmem:[#allocation6 + $0x78] sm:$0xf0] }
 0x178   :  { %v1275_v6 = vadd.f32 %v1274_v3, %v1261_v63  ;;  %v3046_v52 = vor.u32 %v3636_v45, %v3043_v47 }
 0x17a   :  { %v1339_v11 = vmax.f32 %v1275_v6, 0.0  ;;  %v3011_v6 = vld [vmem:[#allocation6 + $0x38] sm:$0xf0] }
 0x17b   :  { %2242 = vmatpush.bf16.msrb.mxu0 %v2994_v61  ;;  %2252 = vmatpush.bf16.msrb.mxu1 %v3186_v0  ;;  %v3680_v61 = vld [vmem:[#allocation6 + $0x1cc] sm:$0xf]  ;;  %v3298_v0 = vor.u32 %v3702_v58, %v3297_v53 }
 0x17c   :  { %v4050_v21 = vpack.c.bf16 %v1339_v11, %v1335_v10  ;;  %v3222_v4 = vor.u32 %v3680_v61, %v3219_v62  ;;  %v3282_v10 = vor.u32 %v3698_v5, %v3281_v2  ;;  %v3014_v11 = vor.u32 %v3628_v46, %v3011_v6  ;;  %v3712_v53 = vld [vmem:[#allocation6 + $0x2cc] sm:$0xf]  ;;  %v3139_v61 = vld [vmem:[#allocation6 + $0x138] sm:$0xf0]  ;;  %v3441_v2 = vld [vmem:[#allocation6 + $0x388] sm:$0xf] }
 0x17d   :  { %v3708_v62 = vld [vmem:[#allocation6 + $0x2ac] sm:$0xf]  ;;  %v3315_v46 = vld [vmem:[#allocation6 + $0x298] sm:$0xf0] }
 0x17e   :  { %2201 = vmatmul.bf16.vlgmr.msra.gmra.mxu1 %v4046_v24  ;;  %2243 = vmatmul.bf16.vlgmr.msrb.gmra.mxu0 %v4042_v36  ;;  %v3704_v5 = vld [vmem:[#allocation6 + $0x28c] sm:$0xf] }
 0x17f   :  { %2291 = vmatpush.bf16.msra.mxu0 %v3110_v40  ;;  %2159 = vmatmul.bf16.vlgmr.msrb.gmra.mxu2 %v4050_v21 }
 0x180   :  { %2253 = vmatpush.bf16.msrb.mxu1 %v3170_v12  ;;  %2263 = vmatpush.bf16.msrb.mxu2 %v3362_v14  ;;  %v3265_v12 = vld [vmem:[#allocation6 + $0x228] sm:$0xf] }
 0x181   :  { %v1286_v28 = vpop.f32.mrf.mxu0 }
 0x182   :  { %v1287_v54 = vadd.f32 %v1286_v28, %v464_v18 }
 0x183   :  { %2292 = vmatpush.bf16.msra.mxu0 %v3094_v16  ;;  %v1300_v48 = vpop.f32.mrf.mxu1  ;;  %v3206_v16 = vor.u32 %v3676_v7, %v3203_v55  ;;  %v3318_v55 = vor.u32 %v3704_v5, %v3315_v46 }
 0x184   :  { %2254 = vmatpush.bf16.msrb.mxu1 %v3154_v27  ;;  %2264 = vmatpush.bf16.msrb.mxu2 %v3346_v29  ;;  %v1301_v3 = vadd.f32 %v1300_v48, %v1287_v54  ;;  %v3347_v54 = vld [vmem:[#allocation6 + $0x2d8] sm:$0xf0] }
 0x185   :  { %v3350_v59 = vor.u32 %v3712_v53, %v3347_v54  ;;  %v3728_v53 = vld [vmem:[#allocation6 + $0x34c] sm:$0xf]  ;;  %v3411_v54 = vld [vmem:[#allocation6 + $0x358] sm:$0xf0] }
 0x187   :  { %2293 = vmatpush.bf16.msra.mxu0 %v3078_v30  ;;  %v3266_v30 = vor.u32 %v3694_v17, %v3265_v12  ;;  %v3730_v17 = vld [vmem:[#allocation6 + $0x354] sm:$0xf0] }
 0x188   :  { %2255 = vmatpush.bf16.msrb.mxu1 %v3138_v37  ;;  %2265 = vmatpush.bf16.msrb.mxu2 %v3330_v38  ;;  %v3668_v37 = vld [vmem:[#allocation6 + $0x16c] sm:$0xf]  ;;  %v3171_v38 = vld [vmem:[#allocation6 + $0x178] sm:$0xf0] }
 0x189   :  { %v1288_v60 = vpop.f32.mrf.mxu0  ;;  %v3174_v48 = vor.u32 %v3668_v37, %v3171_v38  ;;  %v3378_v37 = vor.u32 %v3722_v32, %v3377_v31 }
 0x18a   :  { %v1289_v40 = vadd.f32 %v1288_v60, %v464_v18  ;;  %v3750_v18 = vld [vmem:[#allocation6 + $0x3f4] sm:$0xf0] }
 0x18b   :  { %2294 = vmatpush.bf16.msra.mxu0 %v3062_v39  ;;  %v1302_v56 = vpop.f32.mrf.mxu1  ;;  %v3716_v39 = vld [vmem:[#allocation6 + $0x2ec] sm:$0xf]  ;;  %v3490_v45 = vor.u32 %v3750_v18, %v3489_v35  ;;  %v3742_v60 = vld [vmem:[#allocation6 + $0x3b4] sm:$0xf0]  ;;  %v3491_v18 = vld [vmem:[#allocation6 + $0x3f8] sm:$0xf0] }
 0x18c   :  { %2256 = vmatpush.bf16.msrb.mxu1 %v3122_v51  ;;  %2266 = vmatpush.bf16.msrb.mxu2 %v3314_v26  ;;  %v1303_v14 = vadd.f32 %v1302_v56, %v1289_v40  ;;  %v3366_v49 = vor.u32 %v3716_v39, %v3363_v41  ;;  %v3746_v51 = vld [vmem:[#allocation6 + $0x3d4] sm:$0xf0]  ;;  %v3664_v26 = vld [vmem:[#allocation6 + $0x14c] sm:$0xf]  ;;  %v3475_v41 = vld [vmem:[#allocation6 + $0x3d8] sm:$0xf0] }
 0x18d   :  { %v1314_v15 = vpop.f32.mrf.mxu2  ;;  %v3656_v40 = vld [vmem:[#allocation6 + $0x10c] sm:$0xf]  ;;  %v3734_v56 = vld [vmem:[#allocation6 + $0x374] sm:$0xf0] }
 0x18e   :  { %v1328_v63 = vpop.f32.mrf.mxu3  ;;  %v1315_v8 = vadd.f32 %v1314_v15, %v1301_v3  ;;  %v3660_v15 = vld [vmem:[#allocation6 + $0x12c] sm:$0xf]  ;;  %v3738_v3 = vld [vmem:[#allocation6 + $0x394] sm:$0xf0] }
 0x18f   :  { %2295 = vmatpush.bf16.msra.mxu0 %v3046_v52  ;;  %2257 = vmatmul.bf16.vlgmr.msrb.gmra.mxu1 %v4046_v24  ;;  %v3155_v52 = vld [vmem:[#allocation6 + $0x158] sm:$0xf0]  ;;  %v3442_v6 = vor.u32 %v3738_v3, %v3441_v2  ;;  %v3748_v35 = vld [vmem:[#allocation6 + $0x3ec] sm:$0xf] }
 0x190   :  { %2305 = vmatpush.bf16.msra.mxu1 %v3238_v57  ;;  %2215 = vmatmul.bf16.vlgmr.msra.gmra.mxu2 %v4050_v21  ;;  %v1329_v27 = vadd.f32 %v1328_v63, %v1315_v8  ;;  %v3474_v57 = vor.u32 %v3746_v51, %v3473_v50  ;;  %v3158_v58 = vor.u32 %v3664_v26, %v3155_v52  ;;  %v3331_v63 = vld [vmem:[#allocation6 + $0x2b8] sm:$0xf0]  ;;  %v3425_v8 = vld [vmem:[#allocation6 + $0x368] sm:$0xf]  ;;  %v3744_v39 = vld [vmem:[#allocation6 + $0x3cc] sm:$0xf] }
 0x191   :  { %2267 = vmatpush.bf16.msrb.mxu2 %v3298_v0  ;;  %v3458_v0 = vor.u32 %v3742_v60, %v3457_v9  ;;  %v3426_v12 = vor.u32 %v3734_v56, %v3425_v8  ;;  %v3494_v38 = vor.u32 %v3748_v35, %v3491_v18  ;;  %v3732_v51 = vld [vmem:[#allocation6 + $0x36c] sm:$0xf]  ;;  %v3427_v26 = vld [vmem:[#allocation6 + $0x378] sm:$0xf0] }
 0x192   :  { %v1336_v42 = vmax.f32 %v1329_v27, 0.0  ;;  %v3726_v27 = vld [vmem:[#allocation6 + $0x334] sm:$0xf0]  ;;  %v3430_v52 = vor.u32 %v3732_v51, %v3427_v26  ;;  %v3720_v60 = vld [vmem:[#allocation6 + $0x30c] sm:$0xf] }
 0x193   :  { %2296 = vmatpush.bf16.msra.mxu0 %v3030_v1  ;;  %v3334_v1 = vor.u32 %v3708_v62, %v3331_v63 }
 0x194   :  { %2306 = vmatpush.bf16.msra.mxu1 %v3222_v4  ;;  %v3123_v4 = vld [vmem:[#allocation6 + $0x118] sm:$0xf0] }
 0x195   :  { %v1316_v22 = vpop.f32.mrf.mxu2  ;;  %2268 = vmatpush.bf16.msrb.mxu2 %v3282_v10  ;;  %v3126_v7 = vor.u32 %v3656_v40, %v3123_v4  ;;  %v3700_v10 = vld [vmem:[#allocation6 + $0x26c] sm:$0xf] }
 0x196   :  { %v1317_v28 = vadd.f32 %v1316_v22, %v1303_v14  ;;  %v1330_v29 = vpop.f32.mrf.mxu3 }
 0x197   :  { %2297 = vmatpush.bf16.msra.mxu0 %v3014_v11  ;;  %v3299_v11 = vld [vmem:[#allocation6 + $0x278] sm:$0xf0] }
 0x198   :  { %v1331_v33 = vadd.f32 %v1330_v29, %v1317_v28  ;;  %2307 = vmatpush.bf16.msra.mxu1 %v3206_v16  ;;  %v3302_v14 = vor.u32 %v3700_v10, %v3299_v11  ;;  %v3409_v16 = vld [vmem:[#allocation6 + $0x348] sm:$0xf]  ;;  %v3692_v28 = vld [vmem:[#allocation6 + $0x22c] sm:$0xf]  ;;  %v3267_v29 = vld [vmem:[#allocation6 + $0x238] sm:$0xf0] }
 0x199   :  { %2269 = vmatpush.bf16.msrb.mxu2 %v3266_v30  ;;  %v3410_v22 = vor.u32 %v3730_v17, %v3409_v16  ;;  %v3394_v30 = vor.u32 %v3726_v27, %v3393_v25  ;;  %v1473_v17 = vld [vmem:[%s4092_s9] sm:$0xf] }
 0x19a   :  { %v1340_v43 = vmax.f32 %v1331_v33, 0.0  ;;  %v3688_v33 = vld [vmem:[#allocation6 + $0x20c] sm:$0xf]  ;;  %v1476_v20 = vperm.slane %v1473_v17, 1 }
 0x19b   :  { %2298 = vmatpush.bf16.msra.mxu0 %v2998_v13  ;;  %v3270_v13 = vor.u32 %v3692_v28, %v3267_v29  ;;  %v1477_v28 = vperm.slane %v1473_v17, 2 }
 0x19c   :  { %v4058_v47 = vpack.c.bf16 %v1340_v43, %v1336_v42  ;;  %2308 = vmatpush.bf16.msra.mxu1 %v3190_v34  ;;  %v3251_v34 = vld [vmem:[#allocation6 + $0x218] sm:$0xf0]  ;;  %v3478_v42 = vor.u32 %v3744_v39, %v3475_v41  ;;  %v3740_v43 = vld [vmem:[#allocation6 + $0x3ac] sm:$0xf] }
 0x19d   :  { %2270 = vmatpush.bf16.msrb.mxu2 %v3250_v44  ;;  %v3459_v44 = vld [vmem:[#allocation6 + $0x3b8] sm:$0xf0] }
 0x19e   :  { %2173 = vmatmul.bf16.vlgmr.msrb.gmra.mxu3 %v4058_v47  ;;  %2299 = vmatmul.bf16.vlgmr.msra.gmra.mxu0 %v4042_v36  ;;  %v3142_v36 = vor.u32 %v3660_v15, %v3139_v61 }
 0x19f   :  { %2277 = vmatpush.bf16.msrb.mxu3 %v3490_v45  ;;  %v3462_v45 = vor.u32 %v3740_v43, %v3459_v44 }
 0x1a0   :  { %2309 = vmatpush.bf16.msra.mxu1 %v3174_v48  ;;  %2271 = vmatmul.bf16.vlgmr.msrb.gmra.mxu2 %v4050_v21  ;;  %v3736_v48 = vld [vmem:[#allocation6 + $0x38c] sm:$0xf] }
 0x1a1   :  { %2319 = vmatpush.bf16.msra.mxu2 %v3366_v49  ;;  %v3443_v49 = vld [vmem:[#allocation6 + $0x398] sm:$0xf0] }
 0x1a2   :  { %v3446_v50 = vor.u32 %v3736_v48, %v3443_v49 }
 0x1a3   :  { %2278 = vmatpush.bf16.msrb.mxu3 %v3474_v57  ;;  %v3414_v57 = vor.u32 %v3728_v53, %v3411_v54 }
 0x1a4   :  { %2310 = vmatpush.bf16.msra.mxu1 %v3158_v58  ;;  %v3724_v58 = vld [vmem:[#allocation6 + $0x32c] sm:$0xf] }
 0x1a5   :  { %2320 = vmatpush.bf16.msra.mxu2 %v3350_v59  ;;  %v3395_v59 = vld [vmem:[#allocation6 + $0x338] sm:$0xf0] }
 0x1a6   :  { %v3398_v9 = vor.u32 %v3724_v58, %v3395_v59 }
 0x1a7   :  { %2279 = vmatpush.bf16.msrb.mxu3 %v3458_v0 }
 0x1a8   :  { %2311 = vmatpush.bf16.msra.mxu1 %v3142_v36 }
 0x1a9   :  { %2321 = vmatpush.bf16.msra.mxu2 %v3334_v1 }
 0x1ab   :  { %2280 = vmatpush.bf16.msrb.mxu3 %v3442_v6 }
 0x1ac   :  { %2312 = vmatpush.bf16.msra.mxu1 %v3126_v7 }
 0x1ad   :  { %2322 = vmatpush.bf16.msra.mxu2 %v3318_v55 }
 0x1ae   :  { %2229 = vmatmul.bf16.vlgmr.msra.gmra.mxu3 %v4058_v47 }
 0x1af   :  { %2281 = vmatpush.bf16.msrb.mxu3 %v3426_v12  ;;  %2313 = vmatmul.bf16.vlgmr.msra.gmra.mxu1 %v4046_v24  ;;  %v3254_v24 = vor.u32 %v3688_v33, %v3251_v34 }
 0x1b1   :  { %2323 = vmatpush.bf16.msra.mxu2 %v3302_v14 }
 0x1b3   :  { %2282 = vmatpush.bf16.msrb.mxu3 %v3410_v22  ;;  %v1475_v22 = vperm.slane %v1473_v17, 0 }
 0x1b5   :  { %2324 = vmatpush.bf16.msra.mxu2 %v3286_v23 }
 0x1b7   :  { %2283 = vmatpush.bf16.msrb.mxu3 %v3394_v30 }
 0x1b9   :  { %2325 = vmatpush.bf16.msra.mxu2 %v3270_v13 }
 0x1bb   :  { %2284 = vmatpush.bf16.msrb.mxu3 %v3378_v37 }
 0x1bd   :  { %2326 = vmatpush.bf16.msra.mxu2 %v3254_v24 }
 0x1be   :  { %2285 = vmatmul.bf16.vlgmr.msrb.gmra.mxu3 %v4058_v47 }
 0x1bf   :  { %2333 = vmatpush.bf16.msra.mxu3 %v3494_v38 }
 0x1c0   :  { %2327 = vmatmul.bf16.vlgmr.msra.gmra.mxu2 %v4050_v21  ;;  %v3379_v21 = vld [vmem:[#allocation6 + $0x318] sm:$0xf0] }
 0x1c1   :  { %v3382_v15 = vor.u32 %v3720_v60, %v3379_v21 }
 0x1c3   :  { %2334 = vmatpush.bf16.msra.mxu3 %v3478_v42  ;;  %v1478_v42 = vperm.slane %v1473_v17, 3 }
 0x1c7   :  { %2335 = vmatpush.bf16.msra.mxu3 %v3462_v45 }
 0x1cb   :  { %2336 = vmatpush.bf16.msra.mxu3 %v3446_v50  ;;  %v2355_v50 = vld [vmem:[%s4093_s10] sm:$0xf]  ;;  %s3872_s10 = smov [#allocation8]  }
 0x1cc   :  { %s2430_s29 = sshll.u32 %s3872_s10, 4  ;;  %s2431_s29 = int_to_ptr.vmem [resolvable:$true] %s2430_s29 }
 0x1cf   :  { %2337 = vmatpush.bf16.msra.mxu3 %v3430_v52 }
 0x1d3   :  { %2338 = vmatpush.bf16.msra.mxu3 %v3414_v57 }
 0x1d7   :  { %2339 = vmatpush.bf16.msra.mxu3 %v3398_v9  ;;  %v2358_v9 = vperm.slane %v2355_v50, 1 }
 0x1db   :  { %2340 = vmatpush.bf16.msra.mxu3 %v3382_v15  ;;  %v2132_v61 = vpop.f32.mrf.mxu0 }
 0x1dc   :  { %v2133_v44 = vadd.f32 %v2132_v61, %v1475_v22  ;;  %v2357_v61 = vperm.slane %v2355_v50, 0 }
 0x1de   :  { %2341 = vmatmul.bf16.vlgmr.msra.gmra.mxu3 %v4058_v47 }
 0x1e3   :  { %v2134_v0 = vpop.f32.mrf.mxu0 }
 0x1e4   :  { %v2135_v29 = vadd.f32 %v2134_v0, %v1475_v22 }
 0x1eb   :  { %v2146_v62 = vpop.f32.mrf.mxu1  ;;  %v2188_v3 = vpop.f32.mrf.mxu0 }
 0x1ec   :  { %v2189_v24 = vadd.f32 %v2188_v3, %v1476_v20  ;;  %v2147_v52 = vadd.f32 %v2146_v62, %v2133_v44 }
 0x1f3   :  { %v2148_v1 = vpop.f32.mrf.mxu1  ;;  %v2190_v46 = vpop.f32.mrf.mxu0 }
 0x1f4   :  { %v2191_v27 = vadd.f32 %v2190_v46, %v1476_v20  ;;  %v2149_v32 = vadd.f32 %v2148_v1, %v2135_v29  ;;  %v2359_v1 = vperm.slane %v2355_v50, 2 }
 0x1fb   :  { %v2202_v4 = vpop.f32.mrf.mxu1  ;;  %v2244_v8 = vpop.f32.mrf.mxu0 }
 0x1fc   :  { %v2203_v45 = vadd.f32 %v2202_v4, %v2189_v24  ;;  %v2245_v48 = vadd.f32 %v2244_v8, %v1477_v28 }
 0x202   :  { %v2160_v63 = vpop.f32.mrf.mxu2 }
 0x203   :  { %v2204_v7 = vpop.f32.mrf.mxu1  ;;  %v2246_v11 = vpop.f32.mrf.mxu0  ;;  %v2161_v15 = vadd.f32 %v2160_v63, %v2147_v52 }
 0x204   :  { %v2205_v13 = vadd.f32 %v2204_v7, %v2191_v27  ;;  %v2247_v31 = vadd.f32 %v2246_v11, %v1477_v28 }
 0x20a   :  { %v2162_v2 = vpop.f32.mrf.mxu2 }
 0x20b   :  { %v2163_v35 = vadd.f32 %v2162_v2, %v2149_v32 }
 0x20c   :  { %v2258_v10 = vpop.f32.mrf.mxu1 }
 0x20d   :  { %v2259_v53 = vadd.f32 %v2258_v10, %v2245_v48 }
 0x213   :  { %v2216_v5 = vpop.f32.mrf.mxu2 }
 0x214   :  { %v2260_v14 = vpop.f32.mrf.mxu1  ;;  %v2217_v54 = vadd.f32 %v2216_v5, %v2203_v45 }
 0x215   :  { %v2261_v33 = vadd.f32 %v2260_v14, %v2247_v31  ;;  %v2360_v14 = vperm.slane %v2355_v50, 3 }
 0x21b   :  { %v2218_v55 = vpop.f32.mrf.mxu2  ;;  %v2300_v19 = vpop.f32.mrf.mxu0 }
 0x21c   :  { %v2219_v34 = vadd.f32 %v2218_v55, %v2205_v13  ;;  %v2301_v59 = vadd.f32 %v2300_v19, %v1478_v42 }
 0x221   :  { %v4068_v36 = vpop.f32.mrf.mxu3 }
 0x222   :  { %v2175_v46 = vadd.f32 %v4068_v36, %v2161_v15 }
 0x223   :  { %v2272_v47 = vpop.f32.mrf.mxu2  ;;  %v2302_v38 = vpop.f32.mrf.mxu0 }
 0x224   :  { %v2303_v51 = vadd.f32 %v2302_v38, %v1478_v42  ;;  %v2273_v2 = vadd.f32 %v2272_v47, %v2259_v53  ;;  %v2347_v17 = vmax.f32 %v2175_v46, 0.0 }
 0x229   :  { %v2176_v40 = vpop.f32.mrf.mxu3 }
 0x22a   :  { %v2177_v39 = vadd.f32 %v2176_v40, %v2163_v35 }
 0x22b   :  { %v2274_v16 = vpop.f32.mrf.mxu2 }
 0x22c   :  { %v2314_v23 = vpop.f32.mrf.mxu1  ;;  %v2275_v18 = vadd.f32 %v2274_v16, %v2261_v33  ;;  %v2351_v57 = vmax.f32 %v2177_v39, 0.0 }
 0x22d   :  { %v2315_v3 = vadd.f32 %v2314_v23, %v2301_v59 }
 0x22e   :  { %v2369_v7 = vmul.f32 %v2357_v61, %v2351_v57 }
 0x231   :  { %v2230_v6 = vpop.f32.mrf.mxu3 }
 0x232   :  { %v2231_v0 = vadd.f32 %v2230_v6, %v2217_v54 }
 0x234   :  { %v2316_v49 = vpop.f32.mrf.mxu1  ;;  %v2348_v10 = vmax.f32 %v2231_v0, 0.0 }
 0x235   :  { %v2317_v60 = vadd.f32 %v2316_v49, %v2303_v51 }
 0x236   :  { %v2366_v20 = vmul.f32 %v2358_v9, %v2348_v10 }
 0x239   :  { %v2232_v56 = vpop.f32.mrf.mxu3 }
 0x23a   :  { %v2233_v37 = vadd.f32 %v2232_v56, %v2219_v34 }
 0x23c   :  { %v2352_v26 = vmax.f32 %v2233_v37, 0.0 }
 0x23e   :  { %v2370_v40 = vmul.f32 %v2358_v9, %v2352_v26 }
 0x240   :  { %v2378_v63 = vadd.f32 %v2370_v40, %v2369_v7 }
 0x241   :  { %v2286_v12 = vpop.f32.mrf.mxu3 }
 0x242   :  { %v2287_v55 = vadd.f32 %v2286_v12, %v2273_v2 }
 0x243   :  { %v2328_v30 = vpop.f32.mrf.mxu2 }
 0x244   :  { %v2329_v5 = vadd.f32 %v2328_v30, %v2315_v3  ;;  %v2349_v6 = vmax.f32 %v2287_v55, 0.0  ;;  %v3761_v30 = vld [vmem:[#allocation2] ss:$0 sm:$0xff] }
 0x246   :  { %v2367_v36 = vmul.f32 %v2359_v1, %v2349_v6 }
 0x249   :  { %v2288_v25 = vpop.f32.mrf.mxu3 }
 0x24a   :  { %v2289_v43 = vadd.f32 %v2288_v25, %v2275_v18  ;;  %v2365_v25 = vmul.f32 %v2357_v61, %v2347_v17 }
 0x24b   :  { %v2330_v58 = vpop.f32.mrf.mxu2 }
 0x24c   :  { %v2353_v21 = vmax.f32 %v2289_v43, 0.0  ;;  %v2331_v4 = vadd.f32 %v2330_v58, %v2317_v60  ;;  %v2373_v27 = vadd.f32 %v2366_v20, %v2365_v25 }
 0x24e   :  { %v2371_v8 = vmul.f32 %v2359_v1, %v2353_v21  ;;  %v2374_v28 = vadd.f32 %v2373_v27, %v2367_v36 }
 0x250   :  { %v2379_v47 = vadd.f32 %v2378_v63, %v2371_v8 }
 0x261   :  { %v2342_v41 = vpop.f32.mrf.mxu3 }
 0x262   :  { %v2343_v11 = vadd.f32 %v2342_v41, %v2329_v5 }
 0x264   :  { %v2350_v22 = vmax.f32 %v2343_v11, 0.0 }
 0x266   :  { %v2368_v12 = vmul.f32 %v2360_v14, %v2350_v22 }
 0x268   :  { %v2375_v29 = vadd.f32 %v2374_v28, %v2368_v12 }
 0x269   :  { %v2344_v62 = vpop.f32.mrf.mxu3 }
 0x26a   :  { %v2345_v56 = vadd.f32 %v2344_v62, %v2331_v4 }
 0x26c   :  { %v2354_v16 = vmax.f32 %v2345_v56, 0.0 }
 0x26e   :  { %v2372_v19 = vmul.f32 %v2360_v14, %v2354_v16 }
 0x270   :  { %v2380_v23 = vadd.f32 %v2379_v47, %v2372_v19 }
 0x272   :  { %2381 = vadd.xlane.f32.xlu0 %v2380_v23 }
 0x27a   :  { %2376 = vadd.xlane.f32.xlu0 %v2375_v29 }
 0x2e5   :  { %v2382_v13 = vpop.xlane.xlu0 %2381 }
 0x2e6   :  { %v2388_v31 = vadd.f32 %v3761_v30, %v2382_v13 }
 0x2e8   :  { %v2407_v32 = vmul.f32 1.442695, %v2388_v31 }
 0x2ea   :  { %3762 = vpow2.f32 %v2407_v32 }
 0x2ed   :  { %v2377_v33 = vpop.xlane.xlu0 %2376 }
 0x2ee   :  { %v2387_v34 = vadd.f32 %v3761_v30, %v2377_v33 }
 0x2f0   :  { %v2397_v35 = vsel %vm2396_vm2, %v2387_v34, 0.0  ;;  %v3763_v18 = vpop.eup %3762 }
 0x2f1   :  { %2398 = vadd.xlane.f32.xlu1 %v2397_v35  ;;  %v2410_v37 = vsel %vm2396_vm2, %v3763_v18, 0.0 }
 0x2f9   :  { %2411 = vadd.xlane.f32.xlu1 %v2410_v37 }
 0x364   :  { %v2399_v24 = vpop.xlane.xlu1 %2398 }
 0x365   :  { %v2400_v38 = vrot.slane %v2399_v24, 4 }
 0x367   :  { %v2401_v39 = vadd.f32 %v2400_v38, %v2399_v24 }
 0x369   :  { %v2402_v41 = vrot.slane %v2401_v39, 2 }
 0x36b   :  { %v2403_v42 = vadd.f32 %v2402_v41, %v2401_v39 }
 0x36c   :  { %v2412_v43 = vpop.xlane.xlu1 %2411 }
 0x36d   :  { %v2413_v44 = vrot.slane %v2412_v43, 4  ;;  %v2404_v45 = vrot.slane %v2403_v42, 1 }
 0x36f   :  { %v2414_v48 = vadd.f32 %v2413_v44, %v2412_v43  ;;  %v2405_v49 = vadd.f32 %v2404_v45, %v2403_v42 }
 0x371   :  { %v2415_v50 = vrot.slane %v2414_v48, 2  ;;  %3751 = vpush %v2405_v49 }
 0x373   :  { %v2416_v51 = vadd.f32 %v2415_v50, %v2414_v48 }
 0x375   :  { %v2417_v26 = vrot.slane %v2416_v51, 1 }
 0x377   :  { %v2418_v52 = vadd.f32 %v2417_v26, %v2416_v51 }
 0x379   :  { %3753 = vpush %v2418_v52 }
 0x3a2   :  { %s3752_s16 = spop %3751 }
 0x3a3   :  { %v2420_v53 = vstv %s3752_s16 }
 0x3a4   :  { %2422 = vst.msk [vmem:[#allocation8] sm:$0x1] %vm2421_vm3, %v2420_v53 }
 0x3a5   :  { %2435 = dma.vmem_to_hbm [thread:$0]  %s2431_s29, 16, %s2433_s15, [#allocation5]  }
 0x3aa   :  { %s3754_s6 = spop %3753 }
 0x3ab   :  { %v2423_v54 = vstv %s3754_s6 }
 0x3ac   :  { %2424 = vst.msk [vmem:[#allocation9] sm:$0x1] %vm2421_vm3, %v2423_v54 }
 0x3ad   :  { %2446 = dma.vmem_to_hbm [thread:$0]  %s2442_s18, 16, %s2444_s20, [#allocation10]  }
 0x3ae   :  { %3864 = dma.done.wait [#allocation5], 16  }
 0x3af   :  { %3865 = vsyncadd [#allocation5], 4294967280 }
 0x3b0   :  { %3866 = dma.done.wait [#allocation10], 16  }
 0x3b1   :  { %3867 = vsyncadd [#allocation10], 4294967280 }
 0x3b2   :  { %2455 = vsyncpa [#allocation4], 1 }
 0x3b3   :  { %2456 = vsyncpa [#allocation7], 1 }
 0x3b4   :  { %2457 = vsyncpa [#allocation5], 1 }
 0x3b5   :  { %2458 = vsyncpa [#allocation10], 1 }

</bundles_post_ra>
